<compile_context>
chip_gen: v7x
topology: tpu7x:2x2x1
jax: 0.10.0
libtpu: 0.0.40
codegen_flags: <defaults>
</compile_context>

<pallas_src>
import jax
import jax.numpy as jnp
from jax.experimental import pallas as pl
from jax.experimental.pallas import tpu as pltpu

# ---- architecture (from Qnet.__init__) -------------------------------------
LAYER_DIMS = [(336, 512), (512, 256), (256, 64), (64, 8), (8, 2)]
K_IN = 336
K_PAD = 384          # 3 full 128-lane groups for layer 1's contraction
D_OUT = 2
MAX_TILE_B = 1024    # rows per grid step


def _round_up(x, m):
    return ((x + m - 1) // m) * m


def _choose_tile_b(batch):
    """Rows per grid step: multiple of 16 (bf16 sublane packing), capped at
    MAX_TILE_B, chosen so the grid has an EVEN number of steps whenever the
    batch is large enough (a 'parallel' 1-D grid is split across v7x's 2 TCs).
    NOTE: tile_b is a function of the static batch size, so each distinct
    batch size triggers one recompile."""
    if batch <= 16:
        return 16
    n = 2
    while _round_up(-(-batch // n), 16) > MAX_TILE_B:
        n += 2
    return _round_up(-(-batch // n), 16)


def _vpu_linear(h, w_t):
    """(rows, K) x (K, N) computed as N lane-reductions on the VPU/XLU.
    w_t is the transposed (N, K) weight; returns (rows, N) float32, no bias.
    Used for the tiny N=8 / N=2 layers where an MXU matmul would use only
    8/256 (or 2/256) output columns yet still pay a full push/drain."""
    rows = h.shape[0]
    n = w_t.shape[0]
    lane = jax.lax.broadcasted_iota(jnp.int32, (rows, n), 1)
    out = jnp.zeros((rows, n), jnp.float32)
    for j in range(n):
        col = jnp.sum(h * w_t[j:j + 1, :], axis=-1, keepdims=True)   # (rows, 1)
        out = jnp.where(lane == j, col, out)
    return out


def make_qnet_kernel(n_sub):
    """Whole-MLP forward for one (tile_b, 336) batch tile, processed as n_sub
    row sub-blocks so the MXU matmuls of one sub-block can overlap the VPU
    epilogue (bias + ReLU + bf16 cast) of the other."""

    def qnet_kernel(x_ref,
                    w1_ref, b1_ref,
                    w2_ref, b2_ref,
                    w3_ref, b3_ref,
                    w4t_ref, b4_ref,
                    w5t_ref, b5_ref,
                    out_ref,
                    xpad_ref):
        tile_b = x_ref.shape[0]
        sub = tile_b // n_sub
        for s in range(n_sub):
            r0, r1 = s * sub, (s + 1) * sub

            # In-kernel bf16 cast + zero K-pad 336 -> 384 into a VMEM scratch;
            # no padded/cast copy of x is ever materialized in HBM.
            xpad_ref[r0:r1, :K_IN] = x_ref[r0:r1, :].astype(jnp.bfloat16)
            xpad_ref[r0:r1, K_IN:] = jnp.zeros((sub, K_PAD - K_IN), jnp.bfloat16)

            # Layers 1-3: bf16 MXU matmuls with f32 accumulation; bias + ReLU
            # stay in f32 (v5e's VPU has no bf16 elementwise ops).
            h = jnp.dot(xpad_ref[r0:r1, :], w1_ref[...],
                        preferred_element_type=jnp.float32)
            h = jnp.maximum(h + b1_ref[...], 0.0).astype(jnp.bfloat16)

            h = jnp.dot(h, w2_ref[...], preferred_element_type=jnp.float32)
            h = jnp.maximum(h + b2_ref[...], 0.0).astype(jnp.bfloat16)

            h = jnp.dot(h, w3_ref[...], preferred_element_type=jnp.float32)
            h = jnp.maximum(h + b3_ref[...], 0.0)              # (sub, 64) f32

            # Layers 4 (64->8) and 5 (8->2) on the VPU/XLU, f32.
            h = jnp.maximum(_vpu_linear(h, w4t_ref[...]) + b4_ref[...], 0.0)
            out = _vpu_linear(h, w5t_ref[...]) + b5_ref[...]    # (sub, 2) f32
            out_ref[r0:r1, :] = out.astype(out_ref.dtype)

    return qnet_kernel


def prepare_params(params):
    """One-time weight preparation; call once and reuse across forward calls
    (avoids the per-call f32->bf16 cast pass over ~1.3 MB of weights)."""
    (w1, b1), (w2, b2), (w3, b3), (w4, b4), (w5, b5) = params
    w1_p = jnp.pad(w1, ((0, K_PAD - K_IN), (0, 0))).astype(jnp.bfloat16)
    return (
        w1_p,
        jnp.asarray(b1, jnp.float32).reshape(1, -1),
        w2.astype(jnp.bfloat16),
        jnp.asarray(b2, jnp.float32).reshape(1, -1),
        w3.astype(jnp.bfloat16),
        jnp.asarray(b3, jnp.float32).reshape(1, -1),
        jnp.transpose(w4).astype(jnp.float32),                  # (8, 64) VPU path
        jnp.asarray(b4, jnp.float32).reshape(1, -1),
        jnp.transpose(w5).astype(jnp.float32),                  # (2, 8) VPU path
        jnp.asarray(b5, jnp.float32).reshape(1, -1),
    )


@jax.jit
def qnet_forward(x, prepped):
    """x: (B, 336) float32; prepped: output of prepare_params()."""
    B, d_in = x.shape
    assert d_in == K_IN

    tile_b = _choose_tile_b(B)
    B_pad = _round_up(B, tile_b)
    # Two row sub-blocks per tile once the tile is big enough; sub-block row
    # counts stay multiples of 16 so bf16 sublane-packed slices remain aligned.
    n_sub = 2 if (tile_b >= 128 and tile_b % 32 == 0) else 1

    # Zero-pad ragged batches only (no K pad, no dtype cast in the wrapper).
    x_p = x if B_pad == B else jnp.pad(x, ((0, B_pad - B), (0, 0)))

    (w1_p, b1, w2_c, b2, w3_c, b3, w4_t, b4, w5_t, b5) = prepped

    # Batch is tiled along the grid; weights/biases use constant index_maps so
    # each full weight stays resident in VMEM across all batch tiles.
    x_spec = pl.BlockSpec((tile_b, K_IN), lambda i: (i, 0))
    param_specs = [
        pl.BlockSpec((K_PAD, 512), lambda i: (0, 0)),   # W1 (K-padded, bf16)
        pl.BlockSpec((1, 512), lambda i: (0, 0)),       # b1
        pl.BlockSpec((512, 256), lambda i: (0, 0)),     # W2 (bf16)
        pl.BlockSpec((1, 256), lambda i: (0, 0)),       # b2
        pl.BlockSpec((256, 64), lambda i: (0, 0)),      # W3 (bf16)
        pl.BlockSpec((1, 64), lambda i: (0, 0)),        # b3
        pl.BlockSpec((8, 64), lambda i: (0, 0)),        # W4^T (f32, VPU path)
        pl.BlockSpec((1, 8), lambda i: (0, 0)),         # b4
        pl.BlockSpec((2, 8), lambda i: (0, 0)),         # W5^T (f32, VPU path)
        pl.BlockSpec((1, 2), lambda i: (0, 0)),         # b5
    ]
    out_spec = pl.BlockSpec((tile_b, D_OUT), lambda i: (i, 0))

    out = pl.pallas_call(
        make_qnet_kernel(n_sub),
        out_shape=jax.ShapeDtypeStruct((B_pad, D_OUT), jnp.float32),
        grid_spec=pltpu.PrefetchScalarGridSpec(
            num_scalar_prefetch=0,
            grid=(B_pad // tile_b,),
            in_specs=[x_spec] + param_specs,
            out_specs=out_spec,
            scratch_shapes=[pltpu.VMEM((tile_b, K_PAD), jnp.bfloat16)],
        ),
        compiler_params=pltpu.CompilerParams(
            dimension_semantics=("parallel",),
            vmem_limit_bytes=48 * 1024 * 1024,
        ),
    )(x_p, w1_p, b1, w2_c, b2, w3_c, b3, w4_t, b4, w5_t, b5)

    if B_pad != B:
        out = out[:B]
    return out


def init_params(key):
    """Deterministic init mimicking PyTorch Linear default (uniform +-1/sqrt(fan_in))."""
    params = []
    for (din, dout) in LAYER_DIMS:
        key, kw, kb = jax.random.split(key, 3)
        bound = 1.0 / (din ** 0.5)
        w = jax.random.uniform(kw, (din, dout), jnp.float32, -bound, bound)
        b = jax.random.uniform(kb, (1, dout), jnp.float32, -bound, bound)
        params.append((w, b))
    return params


def qnet_reference(x, params):
    """Pure-JAX reference mirroring the kernel's numerics:
    layers 1-3 bf16 matmul / f32 accumulation, layers 4-5 f32."""
    # TODO(synk): layers 1-3 use bf16 on the MXU; switch to f32 matmuls if the
    # consumer needs exact parity with a full-f32 PyTorch Qnet.
    h = x
    for (w, b) in params[:3]:
        h = jnp.dot(h.astype(jnp.bfloat16), w.astype(jnp.bfloat16),
                    preferred_element_type=jnp.float32) + b
        h = jnp.maximum(h, 0.0)
    w4, b4 = params[3]
    h = jnp.maximum(jnp.dot(h, w4, preferred_element_type=jnp.float32) + b4, 0.0)
    w5, b5 = params[4]
    return jnp.dot(h, w5, preferred_element_type=jnp.float32) + b5


if __name__ == "__main__":
    key = jax.random.PRNGKey(0)
    key, kx1, kx2 = jax.random.split(key, 3)
    params = init_params(key)
    prepped = prepare_params(params)

    def check(x):
        out = jax.block_until_ready(qnet_forward(x, prepped))
        ref = qnet_reference(x, params)
        assert out.shape == (x.shape[0], D_OUT), out.shape
        max_err = float(jnp.max(jnp.abs(out - ref)))
        assert jnp.allclose(out, ref, atol=1e-2, rtol=1e-2), f"max abs err {max_err}"

    # Small batch: single tile, exercises the batch-padding path.
    check(jax.random.normal(kx1, (6, K_IN), dtype=jnp.float32))
    # Moderate batch: 2 grid steps (even, megacore-friendly) + in-kernel
    # sub-block split, exercises the multi-tile path.
    check(jax.random.normal(kx2, (300, K_IN), dtype=jnp.float32))

    print("KERNEL_OK")
</pallas_src>

<mosaic_0001>
module attributes {stable_mosaic.version = 11 : i64} {
  func.func @qnet_kernel(%arg0: i32, %arg1: memref<16x336xf32, #tpu.memory_space<vmem>>, %arg2: memref<384x512xbf16, #tpu.memory_space<vmem>>, %arg3: memref<1x512xf32, #tpu.memory_space<vmem>>, %arg4: memref<512x256xbf16, #tpu.memory_space<vmem>>, %arg5: memref<1x256xf32, #tpu.memory_space<vmem>>, %arg6: memref<256x64xbf16, #tpu.memory_space<vmem>>, %arg7: memref<1x64xf32, #tpu.memory_space<vmem>>, %arg8: memref<8x64xf32, #tpu.memory_space<vmem>>, %arg9: memref<1x8xf32, #tpu.memory_space<vmem>>, %arg10: memref<2x8xf32, #tpu.memory_space<vmem>>, %arg11: memref<1x2xf32, #tpu.memory_space<vmem>>, %arg12: memref<16x2xf32, #tpu.memory_space<vmem>>, %arg13: memref<16x384xbf16, #tpu.memory_space<vmem>>) attributes {dimension_semantics = [#tpu.dimension_semantics<parallel>], iteration_bounds = array<i64: 1>, scalar_prefetch = 0 : i64, scratch_operands = 1 : i64, tpu.core_type = #tpu.core_type<tc>, window_params = [{transform_indices = @transform_0, window_bounds = array<i64: 16, 336>}, {pipeline_mode = #tpu.pipeline_mode<synchronous>, transform_indices = @transform_1, window_bounds = array<i64: 384, 512>}, {pipeline_mode = #tpu.pipeline_mode<synchronous>, transform_indices = @transform_2, window_bounds = array<i64: 1, 512>}, {pipeline_mode = #tpu.pipeline_mode<synchronous>, transform_indices = @transform_3, window_bounds = array<i64: 512, 256>}, {pipeline_mode = #tpu.pipeline_mode<synchronous>, transform_indices = @transform_4, window_bounds = array<i64: 1, 256>}, {pipeline_mode = #tpu.pipeline_mode<synchronous>, transform_indices = @transform_5, window_bounds = array<i64: 256, 64>}, {pipeline_mode = #tpu.pipeline_mode<synchronous>, transform_indices = @transform_6, window_bounds = array<i64: 1, 64>}, {pipeline_mode = #tpu.pipeline_mode<synchronous>, transform_indices = @transform_7, window_bounds = array<i64: 8, 64>}, {pipeline_mode = #tpu.pipeline_mode<synchronous>, transform_indices = @transform_8, window_bounds = array<i64: 1, 8>}, {pipeline_mode = #tpu.pipeline_mode<synchronous>, transform_indices = @transform_9, window_bounds = array<i64: 2, 8>}, {pipeline_mode = #tpu.pipeline_mode<synchronous>, transform_indices = @transform_10, window_bounds = array<i64: 1, 2>}, {transform_indices = @transform_11, window_bounds = array<i64: 16, 2>}]} {
    %c0 = arith.constant 0 : index
    %c0_0 = arith.constant 0 : index
    %0 = vector.load %arg1[%c0, %c0_0] : memref<16x336xf32, #tpu.memory_space<vmem>>, vector<16x336xf32>
    %1 = arith.truncf %0 : vector<16x336xf32> to vector<16x336xbf16>
    %c0_1 = arith.constant 0 : index
    %c0_2 = arith.constant 0 : index
    %2 = vector.load %arg13[%c0_1, %c0_2] : memref<16x384xbf16, #tpu.memory_space<vmem>>, vector<16x336xbf16>
    tpu.vector_store %arg13[%c0_1, %c0_2], %1 {strides = array<i32>} : memref<16x384xbf16, #tpu.memory_space<vmem>>, vector<16x336xbf16>,
    %cst = arith.constant 0.000000e+00 : bf16
    %3 = vector.broadcast %cst : bf16 to vector<16x48xbf16>
    %c0_3 = arith.constant 0 : index
    %c336 = arith.constant 336 : index
    %4 = vector.load %arg13[%c0_3, %c336] : memref<16x384xbf16, #tpu.memory_space<vmem>>, vector<16x48xbf16>
    tpu.vector_store %arg13[%c0_3, %c336], %3 {strides = array<i32>} : memref<16x384xbf16, #tpu.memory_space<vmem>>, vector<16x48xbf16>,
    %c0_4 = arith.constant 0 : index
    %c0_5 = arith.constant 0 : index
    %5 = vector.load %arg13[%c0_4, %c0_5] : memref<16x384xbf16, #tpu.memory_space<vmem>>, vector<16x384xbf16>
    %c0_6 = arith.constant 0 : index
    %c0_7 = arith.constant 0 : index
    %6 = vector.load %arg2[%c0_6, %c0_7] : memref<384x512xbf16, #tpu.memory_space<vmem>>, vector<384x512xbf16>
    %cst_8 = arith.constant dense<0.000000e+00> : vector<16x512xf32>
    %7 = tpu.matmul %5, %6, %cst_8 {dimension_numbers = #tpu.dot_dimension_numbers<[1], [0], [0], [1], [0, 0, 1, 1], [], []>} : vector<16x384xbf16>, vector<384x512xbf16>, vector<16x512xf32> -> vector<16x512xf32>
    %c0_9 = arith.constant 0 : index
    %c0_10 = arith.constant 0 : index
    %8 = vector.load %arg3[%c0_9, %c0_10] : memref<1x512xf32, #tpu.memory_space<vmem>>, vector<1x512xf32>
    %9 = vector.broadcast %8 : vector<1x512xf32> to vector<16x512xf32>
    %10 = arith.addf %7, %9 : vector<16x512xf32>
    %cst_11 = arith.constant 0.000000e+00 : f32
    %11 = vector.broadcast %cst_11 : f32 to vector<16x512xf32>
    %12 = arith.maximumf %10, %11 : vector<16x512xf32>
    %13 = arith.truncf %12 : vector<16x512xf32> to vector<16x512xbf16>
    %c0_12 = arith.constant 0 : index
    %c0_13 = arith.constant 0 : index
    %14 = vector.load %arg4[%c0_12, %c0_13] : memref<512x256xbf16, #tpu.memory_space<vmem>>, vector<512x256xbf16>
    %cst_14 = arith.constant dense<0.000000e+00> : vector<16x256xf32>
    %15 = tpu.matmul %13, %14, %cst_14 {dimension_numbers = #tpu.dot_dimension_numbers<[1], [0], [0], [1], [0, 0, 1, 1], [], []>} : vector<16x512xbf16>, vector<512x256xbf16>, vector<16x256xf32> -> vector<16x256xf32>
    %c0_15 = arith.constant 0 : index
    %c0_16 = arith.constant 0 : index
    %16 = vector.load %arg5[%c0_15, %c0_16] : memref<1x256xf32, #tpu.memory_space<vmem>>, vector<1x256xf32>
    %17 = vector.broadcast %16 : vector<1x256xf32> to vector<16x256xf32>
    %18 = arith.addf %15, %17 : vector<16x256xf32>
    %cst_17 = arith.constant 0.000000e+00 : f32
    %19 = vector.broadcast %cst_17 : f32 to vector<16x256xf32>
    %20 = arith.maximumf %18, %19 : vector<16x256xf32>
    %21 = arith.truncf %20 : vector<16x256xf32> to vector<16x256xbf16>
    %c0_18 = arith.constant 0 : index
    %c0_19 = arith.constant 0 : index
    %22 = vector.load %arg6[%c0_18, %c0_19] : memref<256x64xbf16, #tpu.memory_space<vmem>>, vector<256x64xbf16>
    %cst_20 = arith.constant dense<0.000000e+00> : vector<16x64xf32>
    %23 = tpu.matmul %21, %22, %cst_20 {dimension_numbers = #tpu.dot_dimension_numbers<[1], [0], [0], [1], [0, 0, 1, 1], [], []>} : vector<16x256xbf16>, vector<256x64xbf16>, vector<16x64xf32> -> vector<16x64xf32>
    %c0_21 = arith.constant 0 : index
    %c0_22 = arith.constant 0 : index
    %24 = vector.load %arg7[%c0_21, %c0_22] : memref<1x64xf32, #tpu.memory_space<vmem>>, vector<1x64xf32>
    %25 = vector.broadcast %24 : vector<1x64xf32> to vector<16x64xf32>
    %26 = arith.addf %23, %25 : vector<16x64xf32>
    %cst_23 = arith.constant 0.000000e+00 : f32
    %27 = vector.broadcast %cst_23 : f32 to vector<16x64xf32>
    %28 = arith.maximumf %26, %27 : vector<16x64xf32>
    %c0_24 = arith.constant 0 : index
    %c0_25 = arith.constant 0 : index
    %29 = vector.load %arg8[%c0_24, %c0_25] : memref<8x64xf32, #tpu.memory_space<vmem>>, vector<8x64xf32>
    %30 = tpu.iota {dimensions = array<i32: 1>} : vector<16x8xi32>
    %cst_26 = arith.constant 0.000000e+00 : f32
    %31 = vector.broadcast %cst_26 : f32 to vector<16x8xf32>
    %32 = vector.extract_strided_slice %29 {offsets = [0, 0], sizes = [1, 64], strides = [1, 1]} : vector<8x64xf32> to vector<1x64xf32>
    %33 = vector.broadcast %32 : vector<1x64xf32> to vector<16x64xf32>
    %34 = arith.mulf %28, %33 : vector<16x64xf32>
    %cst_27 = arith.constant dense<0.000000e+00> : vector<16xf32>
    %35 = vector.multi_reduction <add>, %34, %cst_27 [1] : vector<16x64xf32> to vector<16xf32>
    %36 = vector.shape_cast %35 : vector<16xf32> to vector<16x1xf32>
    %c0_i32 = arith.constant 0 : i32
    %37 = vector.broadcast %c0_i32 : i32 to vector<16x8xi32>
    %38 = arith.cmpi eq, %30, %37 : vector<16x8xi32>
    %39 = vector.shape_cast %36 : vector<16x1xf32> to vector<16x1xf32>
    %40 = vector.broadcast %39 : vector<16x1xf32> to vector<16x8xf32>
    %41 = arith.select %38, %40, %31 : vector<16x8xi1>, vector<16x8xf32>
    %42 = vector.extract_strided_slice %29 {offsets = [1, 0], sizes = [1, 64], strides = [1, 1]} : vector<8x64xf32> to vector<1x64xf32>
    %43 = vector.broadcast %42 : vector<1x64xf32> to vector<16x64xf32>
    %44 = arith.mulf %28, %43 : vector<16x64xf32>
    %cst_28 = arith.constant dense<0.000000e+00> : vector<16xf32>
    %45 = vector.multi_reduction <add>, %44, %cst_28 [1] : vector<16x64xf32> to vector<16xf32>
    %46 = vector.shape_cast %45 : vector<16xf32> to vector<16x1xf32>
    %c1_i32 = arith.constant 1 : i32
    %47 = vector.broadcast %c1_i32 : i32 to vector<16x8xi32>
    %48 = arith.cmpi eq, %30, %47 : vector<16x8xi32>
    %49 = vector.shape_cast %46 : vector<16x1xf32> to vector<16x1xf32>
    %50 = vector.broadcast %49 : vector<16x1xf32> to vector<16x8xf32>
    %51 = arith.select %48, %50, %41 : vector<16x8xi1>, vector<16x8xf32>
    %52 = vector.extract_strided_slice %29 {offsets = [2, 0], sizes = [1, 64], strides = [1, 1]} : vector<8x64xf32> to vector<1x64xf32>
    %53 = vector.broadcast %52 : vector<1x64xf32> to vector<16x64xf32>
    %54 = arith.mulf %28, %53 : vector<16x64xf32>
    %cst_29 = arith.constant dense<0.000000e+00> : vector<16xf32>
    %55 = vector.multi_reduction <add>, %54, %cst_29 [1] : vector<16x64xf32> to vector<16xf32>
    %56 = vector.shape_cast %55 : vector<16xf32> to vector<16x1xf32>
    %c2_i32 = arith.constant 2 : i32
    %57 = vector.broadcast %c2_i32 : i32 to vector<16x8xi32>
    %58 = arith.cmpi eq, %30, %57 : vector<16x8xi32>
    %59 = vector.shape_cast %56 : vector<16x1xf32> to vector<16x1xf32>
    %60 = vector.broadcast %59 : vector<16x1xf32> to vector<16x8xf32>
    %61 = arith.select %58, %60, %51 : vector<16x8xi1>, vector<16x8xf32>
    %62 = vector.extract_strided_slice %29 {offsets = [3, 0], sizes = [1, 64], strides = [1, 1]} : vector<8x64xf32> to vector<1x64xf32>
    %63 = vector.broadcast %62 : vector<1x64xf32> to vector<16x64xf32>
    %64 = arith.mulf %28, %63 : vector<16x64xf32>
    %cst_30 = arith.constant dense<0.000000e+00> : vector<16xf32>
    %65 = vector.multi_reduction <add>, %64, %cst_30 [1] : vector<16x64xf32> to vector<16xf32>
    %66 = vector.shape_cast %65 : vector<16xf32> to vector<16x1xf32>
    %c3_i32 = arith.constant 3 : i32
    %67 = vector.broadcast %c3_i32 : i32 to vector<16x8xi32>
    %68 = arith.cmpi eq, %30, %67 : vector<16x8xi32>
    %69 = vector.shape_cast %66 : vector<16x1xf32> to vector<16x1xf32>
    %70 = vector.broadcast %69 : vector<16x1xf32> to vector<16x8xf32>
    %71 = arith.select %68, %70, %61 : vector<16x8xi1>, vector<16x8xf32>
    %72 = vector.extract_strided_slice %29 {offsets = [4, 0], sizes = [1, 64], strides = [1, 1]} : vector<8x64xf32> to vector<1x64xf32>
    %73 = vector.broadcast %72 : vector<1x64xf32> to vector<16x64xf32>
    %74 = arith.mulf %28, %73 : vector<16x64xf32>
    %cst_31 = arith.constant dense<0.000000e+00> : vector<16xf32>
    %75 = vector.multi_reduction <add>, %74, %cst_31 [1] : vector<16x64xf32> to vector<16xf32>
    %76 = vector.shape_cast %75 : vector<16xf32> to vector<16x1xf32>
    %c4_i32 = arith.constant 4 : i32
    %77 = vector.broadcast %c4_i32 : i32 to vector<16x8xi32>
    %78 = arith.cmpi eq, %30, %77 : vector<16x8xi32>
    %79 = vector.shape_cast %76 : vector<16x1xf32> to vector<16x1xf32>
    %80 = vector.broadcast %79 : vector<16x1xf32> to vector<16x8xf32>
    %81 = arith.select %78, %80, %71 : vector<16x8xi1>, vector<16x8xf32>
    %82 = vector.extract_strided_slice %29 {offsets = [5, 0], sizes = [1, 64], strides = [1, 1]} : vector<8x64xf32> to vector<1x64xf32>
    %83 = vector.broadcast %82 : vector<1x64xf32> to vector<16x64xf32>
    %84 = arith.mulf %28, %83 : vector<16x64xf32>
    %cst_32 = arith.constant dense<0.000000e+00> : vector<16xf32>
    %85 = vector.multi_reduction <add>, %84, %cst_32 [1] : vector<16x64xf32> to vector<16xf32>
    %86 = vector.shape_cast %85 : vector<16xf32> to vector<16x1xf32>
    %c5_i32 = arith.constant 5 : i32
    %87 = vector.broadcast %c5_i32 : i32 to vector<16x8xi32>
    %88 = arith.cmpi eq, %30, %87 : vector<16x8xi32>
    %89 = vector.shape_cast %86 : vector<16x1xf32> to vector<16x1xf32>
    %90 = vector.broadcast %89 : vector<16x1xf32> to vector<16x8xf32>
    %91 = arith.select %88, %90, %81 : vector<16x8xi1>, vector<16x8xf32>
    %92 = vector.extract_strided_slice %29 {offsets = [6, 0], sizes = [1, 64], strides = [1, 1]} : vector<8x64xf32> to vector<1x64xf32>
    %93 = vector.broadcast %92 : vector<1x64xf32> to vector<16x64xf32>
    %94 = arith.mulf %28, %93 : vector<16x64xf32>
    %cst_33 = arith.constant dense<0.000000e+00> : vector<16xf32>
    %95 = vector.multi_reduction <add>, %94, %cst_33 [1] : vector<16x64xf32> to vector<16xf32>
    %96 = vector.shape_cast %95 : vector<16xf32> to vector<16x1xf32>
    %c6_i32 = arith.constant 6 : i32
    %97 = vector.broadcast %c6_i32 : i32 to vector<16x8xi32>
    %98 = arith.cmpi eq, %30, %97 : vector<16x8xi32>
    %99 = vector.shape_cast %96 : vector<16x1xf32> to vector<16x1xf32>
    %100 = vector.broadcast %99 : vector<16x1xf32> to vector<16x8xf32>
    %101 = arith.select %98, %100, %91 : vector<16x8xi1>, vector<16x8xf32>
    %102 = vector.extract_strided_slice %29 {offsets = [7, 0], sizes = [1, 64], strides = [1, 1]} : vector<8x64xf32> to vector<1x64xf32>
    %103 = vector.broadcast %102 : vector<1x64xf32> to vector<16x64xf32>
    %104 = arith.mulf %28, %103 : vector<16x64xf32>
    %cst_34 = arith.constant dense<0.000000e+00> : vector<16xf32>
    %105 = vector.multi_reduction <add>, %104, %cst_34 [1] : vector<16x64xf32> to vector<16xf32>
    %106 = vector.shape_cast %105 : vector<16xf32> to vector<16x1xf32>
    %c7_i32 = arith.constant 7 : i32
    %107 = vector.broadcast %c7_i32 : i32 to vector<16x8xi32>
    %108 = arith.cmpi eq, %30, %107 : vector<16x8xi32>
    %109 = vector.shape_cast %106 : vector<16x1xf32> to vector<16x1xf32>
    %110 = vector.broadcast %109 : vector<16x1xf32> to vector<16x8xf32>
    %111 = arith.select %108, %110, %101 : vector<16x8xi1>, vector<16x8xf32>
    %c0_35 = arith.constant 0 : index
    %c0_36 = arith.constant 0 : index
    %112 = vector.load %arg9[%c0_35, %c0_36] : memref<1x8xf32, #tpu.memory_space<vmem>>, vector<1x8xf32>
    %113 = vector.broadcast %112 : vector<1x8xf32> to vector<16x8xf32>
    %114 = arith.addf %111, %113 : vector<16x8xf32>
    %cst_37 = arith.constant 0.000000e+00 : f32
    %115 = vector.broadcast %cst_37 : f32 to vector<16x8xf32>
    %116 = arith.maximumf %114, %115 : vector<16x8xf32>
    %c0_38 = arith.constant 0 : index
    %c0_39 = arith.constant 0 : index
    %117 = vector.load %arg10[%c0_38, %c0_39] : memref<2x8xf32, #tpu.memory_space<vmem>>, vector<2x8xf32>
    %118 = tpu.iota {dimensions = array<i32: 1>} : vector<16x2xi32>
    %cst_40 = arith.constant 0.000000e+00 : f32
    %119 = vector.broadcast %cst_40 : f32 to vector<16x2xf32>
    %120 = vector.extract_strided_slice %117 {offsets = [0, 0], sizes = [1, 8], strides = [1, 1]} : vector<2x8xf32> to vector<1x8xf32>
    %121 = vector.broadcast %120 : vector<1x8xf32> to vector<16x8xf32>
    %122 = arith.mulf %116, %121 : vector<16x8xf32>
    %cst_41 = arith.constant dense<0.000000e+00> : vector<16xf32>
    %123 = vector.multi_reduction <add>, %122, %cst_41 [1] : vector<16x8xf32> to vector<16xf32>
    %124 = vector.shape_cast %123 : vector<16xf32> to vector<16x1xf32>
    %c0_i32_42 = arith.constant 0 : i32
    %125 = vector.broadcast %c0_i32_42 : i32 to vector<16x2xi32>
    %126 = arith.cmpi eq, %118, %125 : vector<16x2xi32>
    %127 = vector.shape_cast %124 : vector<16x1xf32> to vector<16x1xf32>
    %128 = vector.broadcast %127 : vector<16x1xf32> to vector<16x2xf32>
    %129 = arith.select %126, %128, %119 : vector<16x2xi1>, vector<16x2xf32>
    %130 = vector.extract_strided_slice %117 {offsets = [1, 0], sizes = [1, 8], strides = [1, 1]} : vector<2x8xf32> to vector<1x8xf32>
    %131 = vector.broadcast %130 : vector<1x8xf32> to vector<16x8xf32>
    %132 = arith.mulf %116, %131 : vector<16x8xf32>
    %cst_43 = arith.constant dense<0.000000e+00> : vector<16xf32>
    %133 = vector.multi_reduction <add>, %132, %cst_43 [1] : vector<16x8xf32> to vector<16xf32>
    %134 = vector.shape_cast %133 : vector<16xf32> to vector<16x1xf32>
    %c1_i32_44 = arith.constant 1 : i32
    %135 = vector.broadcast %c1_i32_44 : i32 to vector<16x2xi32>
    %136 = arith.cmpi eq, %118, %135 : vector<16x2xi32>
    %137 = vector.shape_cast %134 : vector<16x1xf32> to vector<16x1xf32>
    %138 = vector.broadcast %137 : vector<16x1xf32> to vector<16x2xf32>
    %139 = arith.select %136, %138, %129 : vector<16x2xi1>, vector<16x2xf32>
    %c0_45 = arith.constant 0 : index
    %c0_46 = arith.constant 0 : index
    %140 = vector.load %arg11[%c0_45, %c0_46] : memref<1x2xf32, #tpu.memory_space<vmem>>, vector<1x2xf32>
    %141 = vector.broadcast %140 : vector<1x2xf32> to vector<16x2xf32>
    %142 = arith.addf %139, %141 : vector<16x2xf32>
    %c0_47 = arith.constant 0 : index
    %c0_48 = arith.constant 0 : index
    %143 = vector.load %arg12[%c0_47, %c0_48] : memref<16x2xf32, #tpu.memory_space<vmem>>, vector<16x2xf32>
    tpu.vector_store %arg12[%c0_47, %c0_48], %142 {strides = array<i32>} : memref<16x2xf32, #tpu.memory_space<vmem>>, vector<16x2xf32>,
    return
  }
  func.func @transform_0(%arg0: i32) -> (i32, i32) {
    %c0_i32 = arith.constant 0 : i32
    %c0_i32_0 = arith.constant 0 : i32
    return %arg0, %c0_i32 : i32, i32
  }
  func.func @transform_1(%arg0: i32) -> (i32, i32) {
    %c0_i32 = arith.constant 0 : i32
    %c0_i32_0 = arith.constant 0 : i32
    %c0_i32_1 = arith.constant 0 : i32
    return %c0_i32, %c0_i32_0 : i32, i32
  }
  func.func @transform_2(%arg0: i32) -> (i32, i32) {
    %c0_i32 = arith.constant 0 : i32
    %c0_i32_0 = arith.constant 0 : i32
    %c0_i32_1 = arith.constant 0 : i32
    return %c0_i32, %c0_i32_0 : i32, i32
  }
  func.func @transform_3(%arg0: i32) -> (i32, i32) {
    %c0_i32 = arith.constant 0 : i32
    %c0_i32_0 = arith.constant 0 : i32
    %c0_i32_1 = arith.constant 0 : i32
    return %c0_i32, %c0_i32_0 : i32, i32
  }
  func.func @transform_4(%arg0: i32) -> (i32, i32) {
    %c0_i32 = arith.constant 0 : i32
    %c0_i32_0 = arith.constant 0 : i32
    %c0_i32_1 = arith.constant 0 : i32
    return %c0_i32, %c0_i32_0 : i32, i32
  }
  func.func @transform_5(%arg0: i32) -> (i32, i32) {
    %c0_i32 = arith.constant 0 : i32
    %c0_i32_0 = arith.constant 0 : i32
    %c0_i32_1 = arith.constant 0 : i32
    return %c0_i32, %c0_i32_0 : i32, i32
  }
  func.func @transform_6(%arg0: i32) -> (i32, i32) {
    %c0_i32 = arith.constant 0 : i32
    %c0_i32_0 = arith.constant 0 : i32
    %c0_i32_1 = arith.constant 0 : i32
    return %c0_i32, %c0_i32_0 : i32, i32
  }
  func.func @transform_7(%arg0: i32) -> (i32, i32) {
    %c0_i32 = arith.constant 0 : i32
    %c0_i32_0 = arith.constant 0 : i32
    %c0_i32_1 = arith.constant 0 : i32
    return %c0_i32, %c0_i32_0 : i32, i32
  }
  func.func @transform_8(%arg0: i32) -> (i32, i32) {
    %c0_i32 = arith.constant 0 : i32
    %c0_i32_0 = arith.constant 0 : i32
    %c0_i32_1 = arith.constant 0 : i32
    return %c0_i32, %c0_i32_0 : i32, i32
  }
  func.func @transform_9(%arg0: i32) -> (i32, i32) {
    %c0_i32 = arith.constant 0 : i32
    %c0_i32_0 = arith.constant 0 : i32
    %c0_i32_1 = arith.constant 0 : i32
    return %c0_i32, %c0_i32_0 : i32, i32
  }
  func.func @transform_10(%arg0: i32) -> (i32, i32) {
    %c0_i32 = arith.constant 0 : i32
    %c0_i32_0 = arith.constant 0 : i32
    %c0_i32_1 = arith.constant 0 : i32
    return %c0_i32, %c0_i32_0 : i32, i32
  }
  func.func @transform_11(%arg0: i32) -> (i32, i32) {
    %c0_i32 = arith.constant 0 : i32
    %c0_i32_0 = arith.constant 0 : i32
    return %arg0, %c0_i32 : i32, i32
  }
}

</mosaic_0001>

<bundles_post_ra>
// kernel: qnet_forward.1
= control target key start
LH: loop header
LB: loop body
LE: loop exit
PB: predicated region body
PF: predicated region fallthrough
CT: control target
= control target key end

     0   :  { %16 = vsyncpa [#allocation4], 0  ;;  %s2523_s0 = inlined_call_operand.vmem [shape: f32[16,336], index: 0, kind: input, shape index: {}]   ;;  %s2524_s1 = inlined_call_operand.hbm [shape: bf16[384,512], index: 1, kind: input, shape index: {}]   ;;  %s2525_s2 = inlined_call_operand.vmem [shape: f32[1,512], index: 2, kind: input, shape index: {}]   ;;  %s2526_s3 = inlined_call_operand.hbm [shape: bf16[512,256], index: 3, kind: input, shape index: {}]   ;;  %s2527_s4 = inlined_call_operand.vmem [shape: f32[1,256], index: 4, kind: input, shape index: {}]   ;;  %s2528_s5 = inlined_call_operand.vmem [shape: bf16[256,64], index: 5, kind: input, shape index: {}]   ;;  %s2529_s6 = inlined_call_operand.vmem [shape: f32[1,64], index: 6, kind: input, shape index: {}]   ;;  %s2530_s7 = inlined_call_operand.vmem [shape: f32[8,64], index: 7, kind: input, shape index: {}]   ;;  %s2531_s8 = inlined_call_operand.vmem [shape: f32[1,8], index: 8, kind: input, shape index: {}]   ;;  %s2532_s9 = inlined_call_operand.vmem [shape: f32[2,8], index: 9, kind: input, shape index: {}]   ;;  %s2533_s10 = inlined_call_operand.vmem [shape: f32[1,2], index: 10, kind: input, shape index: {}]   ;;  %s2534_s11 = inlined_call_operand.vmem [shape: f32[16,2], index: 11, kind: output, shape index: {}]  }
   0x1   :  { %17 = vsyncpa [#allocation6], 0  ;;  %s2252_s17 = smov [#allocation3]   ;;  %s2204_s21 = scalar_lea.hbm %s2524_s1, 12288 }
   0x2   :  { %s25_s18 = sshll.u32 %s2252_s17, 4  ;;  %p2205_p0 = scmp.ne.s32.totalorder %s2524_s1, %s2204_s21  ;;  %s26_s18 = int_to_ptr.vmem [resolvable:$true] %s25_s18 }
   0x3   :  { %p2208_p1 = scmp.lt.u32.totalorder %s2204_s21, %s2524_s1 }
   0x5   :  { %p2210_p2 = pnand %p2208_p1, %p2205_p0 }
   0x7   :  { %2213 = shalt.err (!%p2210_p2)
}
   0x8   :  { %s2214_s26 = scalar_lea.vmem %s26_s18, 12288  ;;  %p2219_p4 = scmp.lt.s32.totalorder %s26_s18, %s26_s18 }
   0x9   :  { %p2215_p3 = scmp.ne.s32.totalorder %s26_s18, %s2214_s26  ;;  %p2220_p5 = scmp.lt.s32.totalorder %s2214_s26, %s2214_s26 }
   0xb   :  { %p2221_p6 = por %p2220_p5, %p2219_p4 }
   0xd   :  { %p2222_p7 = pnand %p2221_p6, %p2215_p3 }
   0xf   :  { %2225 = shalt.err (!%p2222_p7)
}
  0x10   :  { %s2253_s27 = smov 256   ;;  %s2254_s28 = smov 16  }
  0x11   :  { %31 = dma.hbm_to_vmem [thread:$0]  %s2524_s1, 12288, %s26_s18, [#allocation4], %s2253_s27, %s2253_s27, %s2254_s28  }
  0x12   :  { %s2255_s12 = smov [#allocation5]   ;;  %s2226_s16 = scalar_lea.hbm %s2526_s3, 8192 }
  0x13   :  { %s39_s13 = sshll.u32 %s2255_s12, 4  ;;  %p2227_p8 = scmp.ne.s32.totalorder %s2526_s3, %s2226_s16  ;;  %s40_s13 = int_to_ptr.vmem [resolvable:$true] %s39_s13 }
  0x14   :  { %p2230_p9 = scmp.lt.u32.totalorder %s2226_s16, %s2526_s3 }
  0x16   :  { %p2232_p10 = pnand %p2230_p9, %p2227_p8 }
  0x18   :  { %2235 = shalt.err (!%p2232_p10)
}
  0x19   :  { %s2236_s22 = scalar_lea.vmem %s40_s13, 8192  ;;  %p2241_p12 = scmp.lt.s32.totalorder %s40_s13, %s40_s13 }
  0x1a   :  { %p2237_p11 = scmp.ne.s32.totalorder %s40_s13, %s2236_s22  ;;  %p2242_p13 = scmp.lt.s32.totalorder %s2236_s22, %s2236_s22 }
  0x1c   :  { %p2243_p0 = por %p2242_p13, %p2241_p12 }
  0x1e   :  { %p2244_p1 = pnand %p2243_p0, %p2237_p11 }
  0x20   :  { %2247 = shalt.err (!%p2244_p1)
}
  0x21   :  { %s2256_s1 = smov 128   ;;  %s2257_s18 = smov 8  }
  0x22   :  { %45 = dma.hbm_to_vmem [thread:$0]  %s2526_s3, 8192, %s40_s13, [#allocation6], %s2256_s1, %s2256_s1, %s2257_s18  }
  0x23   :  { %2248 = dma.done.wait [#allocation4], 12288  }
  0x24   :  { %2249 = vsyncadd [#allocation4], 4294955008 }
  0x25   :  { %2250 = dma.done.wait [#allocation6], 8192  }
  0x26   :  { %2251 = vsyncadd [#allocation6], 4294959104  ;;  %v2258_v0 = vmov 0   ;;  %v1948_v1 = vld [vmem:[#allocation3 + $0x4] ss:$16 sps:$4 sm:$0xff]   ;;  %v71_v34 = vld [vmem:[%s2523_s0 + $0x20] sm:$0xff] }
  0x27   :  { %758 = vmatprep.mubr.bf16.mxu0 %v2258_v0  ;;  %v1950_v2 = vld [vmem:[#allocation3] ss:$16 sps:$4 sm:$0xff]   ;;  %683 = vmatprep.subr.bf16.mxu1 %v1948_v1  ;;  %v1951_v3 = vld [vmem:[#allocation3 + $0x24] ss:$16 sps:$4 sm:$0xff]   ;;  %v67_v35 = vld [vmem:[%s2523_s0] sm:$0xff]  ;;  %vm78_vm0 = vcmask 654336  }
  0x28   :  { %684 = vmatpush1.bf16.msra.mxu1 %v1950_v2  ;;  %v1953_v4 = vld [vmem:[#allocation3 + $0x20] ss:$16 sps:$4 sm:$0xff]   ;;  %v1954_v5 = vld [vmem:[#allocation3 + $0x44] ss:$16 sps:$4 sm:$0xff]   ;;  %v69_v41 = vld [vmem:[%s2523_s0 + $0x10] sm:$0xff]  ;;  %vm80_vm1 = vcmask 1048192  }
  0x29   :  { %685 = vmatprep.subr.bf16.mxu1 %v1951_v3  ;;  %v1956_v6 = vld [vmem:[#allocation3 + $0x40] ss:$16 sps:$4 sm:$0xff]   ;;  %v1957_v7 = vld [vmem:[#allocation3 + $0x64] ss:$16 sps:$4 sm:$0xff]   ;;  %v2022_v59 = vld [vmem:[#allocation3 + $0xc] ss:$16 sps:$4 sm:$0xff]  }
  0x2a   :  { %v1959_v8 = vld [vmem:[#allocation3 + $0x60] ss:$16 sps:$4 sm:$0xff]   ;;  %v1960_v9 = vld [vmem:[#allocation3 + $0x84] ss:$16 sps:$4 sm:$0xff]   ;;  %v2020_v60 = vld [vmem:[#allocation3 + $0x8] ss:$16 sps:$4 sm:$0xff]  }
  0x2b   :  { %v1975_v10 = vld [vmem:[#allocation3 + $0x204] ss:$16 sps:$4 sm:$0xff]   ;;  %v1977_v11 = vld [vmem:[#allocation3 + $0x200] ss:$16 sps:$4 sm:$0xff]   ;;  %v2025_v61 = vld [vmem:[#allocation3 + $0x2c] ss:$16 sps:$4 sm:$0xff]  }
  0x2c   :  { %686 = vmatpush1.bf16.msra.mxu1 %v1953_v4  ;;  %v1962_v12 = vld [vmem:[#allocation3 + $0x80] ss:$16 sps:$4 sm:$0xff]   ;;  %726 = vmatprep.subr.bf16.mxu0 %v1975_v10  ;;  %v1981_v13 = vld [vmem:[#allocation3 + $0x224] ss:$16 sps:$4 sm:$0xff]   ;;  %v2023_v62 = vld [vmem:[#allocation3 + $0x28] ss:$16 sps:$4 sm:$0xff]  }
  0x2d   :  { %687 = vmatprep.subr.bf16.mxu1 %v1954_v5  ;;  %727 = vmatpush1.bf16.msra.mxu0 %v1977_v11  ;;  %v1983_v14 = vld [vmem:[#allocation3 + $0x220] ss:$16 sps:$4 sm:$0xff]   ;;  %v1963_v15 = vld [vmem:[#allocation3 + $0xa4] ss:$16 sps:$4 sm:$0xff]   ;;  %v2028_v2 = vld [vmem:[#allocation3 + $0x4c] ss:$16 sps:$4 sm:$0xff]  }
  0x2e   :  { %728 = vmatprep.subr.bf16.mxu0 %v1981_v13  ;;  %v1965_v16 = vld [vmem:[#allocation3 + $0xa0] ss:$16 sps:$4 sm:$0xff]   ;;  %v1987_v17 = vld [vmem:[#allocation3 + $0x244] ss:$16 sps:$4 sm:$0xff]   ;;  %v2026_v5 = vld [vmem:[#allocation3 + $0x48] ss:$16 sps:$4 sm:$0xff]  }
  0x2f   :  { %v1966_v18 = vld [vmem:[#allocation3 + $0xc4] ss:$16 sps:$4 sm:$0xff]   ;;  %v1989_v19 = vld [vmem:[#allocation3 + $0x240] ss:$16 sps:$4 sm:$0xff]   ;;  %v2034_v11 = vld [vmem:[#allocation3 + $0x8c] ss:$16 sps:$4 sm:$0xff]  }
  0x30   :  { %688 = vmatpush1.bf16.msra.mxu1 %v1956_v6  ;;  %v1993_v20 = vld [vmem:[#allocation3 + $0x264] ss:$16 sps:$4 sm:$0xff]   ;;  %v1968_v21 = vld [vmem:[#allocation3 + $0xc0] ss:$16 sps:$4 sm:$0xff]   ;;  %v2032_v13 = vld [vmem:[#allocation3 + $0x88] ss:$16 sps:$4 sm:$0xff]  }
  0x31   :  { %689 = vmatprep.subr.bf16.mxu1 %v1957_v7  ;;  %729 = vmatpush1.bf16.msra.mxu0 %v1983_v14  ;;  %v1969_v22 = vld [vmem:[#allocation3 + $0xe4] ss:$16 sps:$4 sm:$0xff]   ;;  %v1995_v23 = vld [vmem:[#allocation3 + $0x260] ss:$16 sps:$4 sm:$0xff]   ;;  %v2031_v7 = vld [vmem:[#allocation3 + $0x6c] ss:$16 sps:$4 sm:$0xff]  }
  0x32   :  { %730 = vmatprep.subr.bf16.mxu0 %v1987_v17  ;;  %v1999_v24 = vld [vmem:[#allocation3 + $0x284] ss:$16 sps:$4 sm:$0xff]   ;;  %v1971_v25 = vld [vmem:[#allocation3 + $0xe0] ss:$16 sps:$4 sm:$0xff]   ;;  %v2035_v17 = vld [vmem:[#allocation3 + $0xa8] ss:$16 sps:$4 sm:$0xff]  }
  0x33   :  { %v1972_v26 = vld [vmem:[#allocation3 + $0x104] ss:$16 sps:$4 sm:$0xff]   ;;  %v2001_v27 = vld [vmem:[#allocation3 + $0x280] ss:$16 sps:$4 sm:$0xff]   ;;  %vm1542_vm2 = vcmask 523264   ;;  %vm1675_vm11 = vcmask 64512  }
  0x34   :  { %690 = vmatpush1.bf16.msra.mxu1 %v1959_v8  ;;  %v2005_v28 = vld [vmem:[#allocation3 + $0x2a4] ss:$16 sps:$4 sm:$0xff]   ;;  %v1974_v29 = vld [vmem:[#allocation3 + $0x100] ss:$16 sps:$4 sm:$0xff]   ;;  %vm1707_vm12 = vcmask 15360  }
  0x35   :  { %691 = vmatprep.subr.bf16.mxu1 %v1960_v9  ;;  %731 = vmatpush1.bf16.msra.mxu0 %v1989_v19  ;;  %v1978_v30 = vld [vmem:[#allocation3 + $0x124] ss:$16 sps:$4 sm:$0xff]   ;;  %v2007_v31 = vld [vmem:[#allocation3 + $0x2a0] ss:$16 sps:$4 sm:$0xff]   ;;  %v2029_v9 = vld [vmem:[#allocation3 + $0x68] ss:$16 sps:$4 sm:$0xff]  }
  0x36   :  { %732 = vmatprep.subr.bf16.mxu0 %v1993_v20  ;;  %v68_v32 = vld [vmem:[%s2523_s0 + $0x8] sm:$0xff]  ;;  %v70_v37 = vld [vmem:[%s2523_s0 + $0x18] sm:$0xff] }
  0x37   :  { %v2011_v33 = vld [vmem:[#allocation3 + $0x2c4] ss:$16 sps:$4 sm:$0xff]   ;;  %v74_v36 = vpack.c.bf16 %v71_v34, %v68_v32  ;;  %v1980_v38 = vld [vmem:[#allocation3 + $0x120] ss:$16 sps:$4 sm:$0xff]   ;;  %v2356_v40 = vpack.c.bf16 %v70_v37, %v67_v35  ;;  %v2052_v35 = vld [vmem:[#allocation3 + $0x14c] ss:$16 sps:$4 sm:$0xff]  }
  0x38   :  { %692 = vmatpush1.bf16.msra.mxu1 %v1962_v12  ;;  %v2013_v39 = vld [vmem:[#allocation3 + $0x2c0] ss:$16 sps:$4 sm:$0xff]   ;;  %v1984_v43 = vld [vmem:[#allocation3 + $0x144] ss:$16 sps:$4 sm:$0xff]   ;;  %v2050_v37 = vld [vmem:[#allocation3 + $0x148] ss:$16 sps:$4 sm:$0xff]  }
  0x39   :  { %693 = vmatprep.subr.bf16.mxu1 %v1963_v15  ;;  %733 = vmatpush1.bf16.msra.mxu0 %v1995_v23  ;;  %v72_v42 = vld [vmem:[%s2523_s0 + $0x28] sm:$0xff]  ;;  %v2092_v63 = vld [vmem:[#allocation5] ss:$8 sps:$4 sm:$0xff]   ;;  %v2094_v1 = vld [vmem:[#allocation5 + $0x4] ss:$8 sps:$4 sm:$0xff]  }
  0x3a   :  { %734 = vmatprep.subr.bf16.mxu0 %v1999_v24  ;;  %v2017_v44 = vld [vmem:[#allocation3 + $0x2e4] ss:$16 sps:$4 sm:$0xff]   ;;  %v75_v45 = vpack.c.bf16 %v72_v42, %v69_v41  ;;  %715 = vmatprep.mubr.bf16.mxu1 %v74_v36  ;;  %v1986_v46 = vld [vmem:[#allocation3 + $0x140] ss:$16 sps:$4 sm:$0xff]   ;;  %v2037_v15 = vld [vmem:[#allocation3 + $0xac] ss:$16 sps:$4 sm:$0xff]  }
  0x3b   :  { %v2019_v47 = vld [vmem:[#allocation3 + $0x2e0] ss:$16 sps:$4 sm:$0xff]   ;;  %v1990_v48 = vld [vmem:[#allocation3 + $0x164] ss:$16 sps:$4 sm:$0xff]   ;;  %v2043_v23 = vld [vmem:[#allocation3 + $0xec] ss:$16 sps:$4 sm:$0xff]  }
  0x3c   :  { %694 = vmatpush1.bf16.msra.mxu1 %v1965_v16  ;;  %79 = vst.msk [vmem:[#allocation2 + $0x10] sm:$0xff] %vm78_vm0, %v75_v45  ;;  %v1992_v49 = vld [vmem:[#allocation3 + $0x160] ss:$16 sps:$4 sm:$0xff]   ;;  %v1996_v50 = vld [vmem:[#allocation3 + $0x184] ss:$16 sps:$4 sm:$0xff]  }
  0x3d   :  { %695 = vmatprep.subr.bf16.mxu1 %v1966_v18  ;;  %735 = vmatpush1.bf16.msra.mxu0 %v2001_v27  ;;  %81 = vst.msk [vmem:[#allocation2 + $0x10] sm:$0xff] %vm80_vm1, %v2258_v0  ;;  %v1998_v52 = vld [vmem:[#allocation3 + $0x180] ss:$16 sps:$4 sm:$0xff]   ;;  %v2002_v53 = vld [vmem:[#allocation3 + $0x1a4] ss:$16 sps:$4 sm:$0xff]  }
  0x3e   :  { %736 = vmatprep.subr.bf16.mxu0 %v2005_v28  ;;  %v2004_v54 = vld [vmem:[#allocation3 + $0x1a0] ss:$16 sps:$4 sm:$0xff]   ;;  %v2008_v55 = vld [vmem:[#allocation3 + $0x1c4] ss:$16 sps:$4 sm:$0xff]   ;;  %v2040_v18 = vld [vmem:[#allocation3 + $0xcc] ss:$16 sps:$4 sm:$0xff]  }
  0x3f   :  { %v2010_v56 = vld [vmem:[#allocation3 + $0x1c0] ss:$16 sps:$4 sm:$0xff]   ;;  %v2014_v57 = vld [vmem:[#allocation3 + $0x1e4] ss:$16 sps:$4 sm:$0xff]   ;;  %v2046_v27 = vld [vmem:[#allocation3 + $0x10c] ss:$16 sps:$4 sm:$0xff]  }
  0x40   :  { %696 = vmatpush1.bf16.msra.mxu1 %v1968_v21  ;;  %v2016_v58 = vld [vmem:[#allocation3 + $0x1e0] ss:$16 sps:$4 sm:$0xff]   ;;  %v2097_v3 = vld [vmem:[#allocation5 + $0x14] ss:$8 sps:$4 sm:$0xff]   ;;  %v2100_v6 = vld [vmem:[#allocation5 + $0x24] ss:$8 sps:$4 sm:$0xff]  }
  0x41   :  { %697 = vmatprep.subr.bf16.mxu1 %v1969_v22  ;;  %737 = vmatpush1.bf16.msra.mxu0 %v2007_v31  ;;  %v2095_v4 = vld [vmem:[#allocation5 + $0x10] ss:$8 sps:$4 sm:$0xff]   ;;  %v2098_v8 = vld [vmem:[#allocation5 + $0x20] ss:$8 sps:$4 sm:$0xff]   ;;  %v2103_v10 = vld [vmem:[#allocation5 + $0x34] ss:$8 sps:$4 sm:$0xff]  }
  0x42   :  { %738 = vmatprep.subr.bf16.mxu0 %v2011_v33  ;;  %v2101_v12 = vld [vmem:[#allocation5 + $0x30] ss:$8 sps:$4 sm:$0xff]   ;;  %v2106_v14 = vld [vmem:[#allocation5 + $0x44] ss:$8 sps:$4 sm:$0xff]   ;;  %v2104_v16 = vld [vmem:[#allocation5 + $0x40] ss:$8 sps:$4 sm:$0xff]  }
  0x43   :  { %v2109_v19 = vld [vmem:[#allocation5 + $0x54] ss:$8 sps:$4 sm:$0xff]   ;;  %v2107_v20 = vld [vmem:[#allocation5 + $0x50] ss:$8 sps:$4 sm:$0xff]   ;;  %v2112_v22 = vld [vmem:[#allocation5 + $0x64] ss:$8 sps:$4 sm:$0xff]  }
  0x44   :  { %698 = vmatpush1.bf16.msra.mxu1 %v1971_v25  ;;  %v2365_v51 = vld [vmem:[#allocation2 + $0x10] sm:$0xff]  ;;  %v2110_v24 = vld [vmem:[#allocation5 + $0x60] ss:$8 sps:$4 sm:$0xff]  }
  0x45   :  { %699 = vmatprep.subr.bf16.mxu1 %v1972_v26  ;;  %739 = vmatpush1.bf16.msra.mxu0 %v2013_v39  ;;  %v2038_v21 = vld [vmem:[#allocation3 + $0xc8] ss:$16 sps:$4 sm:$0xff]   ;;  %v2115_v26 = vld [vmem:[#allocation5 + $0x74] ss:$8 sps:$4 sm:$0xff]  }
  0x46   :  { %740 = vmatprep.subr.bf16.mxu0 %v2017_v44  ;;  %v2041_v25 = vld [vmem:[#allocation3 + $0xe8] ss:$16 sps:$4 sm:$0xff]   ;;  %v2049_v31 = vld [vmem:[#allocation3 + $0x12c] ss:$16 sps:$4 sm:$0xff]  }
  0x47   :  { %v2113_v28 = vld [vmem:[#allocation5 + $0x70] ss:$8 sps:$4 sm:$0xff]   ;;  %v2116_v32 = vld [vmem:[#allocation5 + $0x80] ss:$8 sps:$4 sm:$0xff]   ;;  %v2121_v34 = vld [vmem:[#allocation5 + $0x94] ss:$8 sps:$4 sm:$0xff]  }
  0x48   :  { %700 = vmatpush1.bf16.msra.mxu1 %v1974_v29  ;;  %v2044_v29 = vld [vmem:[#allocation3 + $0x108] ss:$16 sps:$4 sm:$0xff]   ;;  %v2055_v39 = vld [vmem:[#allocation3 + $0x16c] ss:$16 sps:$4 sm:$0xff]  }
  0x49   :  { %701 = vmatprep.subr.bf16.mxu1 %v1978_v30  ;;  %741 = vmatpush1.bf16.msra.mxu0 %v2019_v47  ;;  %v2118_v30 = vld [vmem:[#allocation5 + $0x84] ss:$8 sps:$4 sm:$0xff]   ;;  %v2047_v33 = vld [vmem:[#allocation3 + $0x128] ss:$16 sps:$4 sm:$0xff]  }
  0x4a   :  { %1263 = vmatprep.subr.bf16.mxu0 %v2094_v1  ;;  %v2122_v41 = vld [vmem:[#allocation5 + $0xa0] ss:$8 sps:$4 sm:$0xff]   ;;  %v2058_v44 = vld [vmem:[#allocation3 + $0x18c] ss:$16 sps:$4 sm:$0xff]   ;;  %v2125_v45 = vld [vmem:[#allocation5 + $0xb0] ss:$8 sps:$4 sm:$0xff]  }
  0x4b   :  { %v2053_v42 = vld [vmem:[#allocation3 + $0x168] ss:$16 sps:$4 sm:$0xff]   ;;  %v2130_v47 = vld [vmem:[#allocation5 + $0xc4] ss:$8 sps:$4 sm:$0xff]  }
  0x4c   :  { %702 = vmatpush1.bf16.msra.mxu1 %v1980_v38  ;;  %759 = vmatmul.mubr.bf16.vlgmr.msra.gmra.mrb[0].mxu0 %v2365_v51  ;;  %v2124_v38 = vld [vmem:[#allocation5 + $0xa4] ss:$8 sps:$4 sm:$0xff]  }
  0x4d   :  { %703 = vmatprep.subr.bf16.mxu1 %v1984_v43  ;;  %1264 = vmatpush1.bf16.msra.mxu0 %v2092_v63  ;;  %v2127_v43 = vld [vmem:[#allocation5 + $0xb4] ss:$8 sps:$4 sm:$0xff]   ;;  %v2077_v63 = vld [vmem:[#allocation3 + $0x268] ss:$16 sps:$4 sm:$0xff]  }
  0x4e   :  { %1265 = vmatprep.subr.bf16.mxu0 %v2097_v3  ;;  %v2082_v1 = vld [vmem:[#allocation3 + $0x28c] ss:$16 sps:$4 sm:$0xff]  }
  0x4f   :  { %v2085_v3 = vld [vmem:[#allocation3 + $0x2ac] ss:$16 sps:$4 sm:$0xff]  }
  0x50   :  { %704 = vmatpush1.bf16.msra.mxu1 %v1986_v46  ;;  %v2056_v46 = vld [vmem:[#allocation3 + $0x188] ss:$16 sps:$4 sm:$0xff]  }
  0x51   :  { %705 = vmatprep.subr.bf16.mxu1 %v1990_v48  ;;  %1266 = vmatpush1.bf16.msra.mxu0 %v2095_v4  ;;  %v2061_v48 = vld [vmem:[#allocation3 + $0x1ac] ss:$16 sps:$4 sm:$0xff]  }
  0x52   :  { %1267 = vmatprep.subr.bf16.mxu0 %v2100_v6  ;;  %v2088_v4 = vld [vmem:[#allocation3 + $0x2cc] ss:$16 sps:$4 sm:$0xff]   ;;  %v2086_v6 = vld [vmem:[#allocation3 + $0x2c8] ss:$16 sps:$4 sm:$0xff]  }
  0x54   :  { %706 = vmatpush1.bf16.msra.mxu1 %v1992_v49  ;;  %v2128_v49 = vld [vmem:[#allocation5 + $0xc0] ss:$8 sps:$4 sm:$0xff]  }
  0x55   :  { %707 = vmatprep.subr.bf16.mxu1 %v1996_v50  ;;  %1268 = vmatpush1.bf16.msra.mxu0 %v2098_v8  ;;  %v2059_v50 = vld [vmem:[#allocation3 + $0x1a8] ss:$16 sps:$4 sm:$0xff]   ;;  %v2136_v8 = vld [vmem:[#allocation5 + $0xe4] ss:$8 sps:$4 sm:$0xff]  }
  0x56   :  { %1269 = vmatprep.subr.bf16.mxu0 %v2103_v10  ;;  %v2089_v10 = vld [vmem:[#allocation3 + $0x2e8] ss:$16 sps:$4 sm:$0xff]  }
  0x58   :  { %708 = vmatpush1.bf16.msra.mxu1 %v1998_v52  ;;  %v2064_v52 = vld [vmem:[#allocation3 + $0x1cc] ss:$16 sps:$4 sm:$0xff]  }
  0x59   :  { %709 = vmatprep.subr.bf16.mxu1 %v2002_v53  ;;  %1270 = vmatpush1.bf16.msra.mxu0 %v2101_v12  ;;  %v2062_v53 = vld [vmem:[#allocation3 + $0x1c8] ss:$16 sps:$4 sm:$0xff]  }
  0x5a   :  { %1271 = vmatprep.subr.bf16.mxu0 %v2106_v14  ;;  %v2137_v12 = vld [vmem:[#allocation5 + $0xf0] ss:$8 sps:$4 sm:$0xff]   ;;  %v2188_v14 = vld [vmem:[%s2528_s5 + $0x40] sm:$0xff]  }
  0x5c   :  { %710 = vmatpush1.bf16.msra.mxu1 %v2004_v54  ;;  %v2067_v54 = vld [vmem:[#allocation3 + $0x1ec] ss:$16 sps:$4 sm:$0xff]  }
  0x5d   :  { %711 = vmatprep.subr.bf16.mxu1 %v2008_v55  ;;  %1272 = vmatpush1.bf16.msra.mxu0 %v2104_v16  ;;  %v2065_v55 = vld [vmem:[#allocation3 + $0x1e8] ss:$16 sps:$4 sm:$0xff]   ;;  %v2190_v16 = vld [vmem:[%s2528_s5 + $0x48] sm:$0xff]  }
  0x5e   :  { %1273 = vmatprep.subr.bf16.mxu0 %v2109_v19 }
  0x60   :  { %712 = vmatpush1.bf16.msra.mxu1 %v2010_v56  ;;  %v2070_v56 = vld [vmem:[#allocation3 + $0x20c] ss:$16 sps:$4 sm:$0xff]  }
  0x61   :  { %713 = vmatprep.subr.bf16.mxu1 %v2014_v57  ;;  %1274 = vmatpush1.bf16.msra.mxu0 %v2107_v20  ;;  %v2068_v57 = vld [vmem:[#allocation3 + $0x208] ss:$16 sps:$4 sm:$0xff]  }
  0x62   :  { %1275 = vmatprep.subr.bf16.mxu0 %v2112_v22  ;;  %v2192_v20 = vld [vmem:[%s2528_s5 + $0x50] sm:$0xff]   ;;  %v183_v22 = vlaneseq }
  0x64   :  { %714 = vmatpush1.bf16.msra.mxu1 %v2016_v58  ;;  %v2073_v58 = vld [vmem:[#allocation3 + $0x22c] ss:$16 sps:$4 sm:$0xff]  }
  0x65   :  { %769 = vmatprep.subr.bf16.mxu1 %v2022_v59  ;;  %1276 = vmatpush1.bf16.msra.mxu0 %v2110_v24  ;;  %v2071_v59 = vld [vmem:[#allocation3 + $0x228] ss:$16 sps:$4 sm:$0xff]   ;;  %v2194_v24 = vld [vmem:[%s2528_s5 + $0x58] sm:$0xff]  }
  0x66   :  { %1277 = vmatprep.subr.bf16.mxu0 %v2115_v26  ;;  %v2195_v26 = vld [vmem:[%s2528_s5 + $0x18] sm:$0xff]  }
  0x67   :  { %716 = vmatmul.mubr.bf16.vlgmr.msra.gmra.mrb[0].mxu1 %v2356_v40 }
  0x68   :  { %770 = vmatpush1.bf16.msra.mxu1 %v2020_v60  ;;  %801 = vmatprep.mubr.bf16.mxu1 %v74_v36  ;;  %v2119_v36 = vld [vmem:[#allocation5 + $0x90] ss:$8 sps:$4 sm:$0xff]   ;;  %v2076_v60 = vld [vmem:[#allocation3 + $0x24c] ss:$16 sps:$4 sm:$0xff]  }
  0x69   :  { %771 = vmatprep.subr.bf16.mxu1 %v2025_v61  ;;  %1278 = vmatpush1.bf16.msra.mxu0 %v2113_v28  ;;  %v2074_v61 = vld [vmem:[#allocation3 + $0x248] ss:$16 sps:$4 sm:$0xff]  }
  0x6a   :  { %1279 = vmatprep.subr.bf16.mxu0 %v2118_v30 }
  0x6c   :  { %772 = vmatpush1.bf16.msra.mxu1 %v2023_v62  ;;  %v2079_v62 = vld [vmem:[#allocation3 + $0x26c] ss:$16 sps:$4 sm:$0xff]  }
  0x6d   :  { %773 = vmatprep.subr.bf16.mxu1 %v2028_v2  ;;  %1280 = vmatpush1.bf16.msra.mxu0 %v2116_v32  ;;  %v2080_v2 = vld [vmem:[#allocation3 + $0x288] ss:$16 sps:$4 sm:$0xff]   ;;  %v2198_v32 = vld [vmem:[%s2528_s5 + $0x68] sm:$0xff]  }
  0x6e   :  { %1281 = vmatprep.subr.bf16.mxu0 %v2121_v34 }
  0x70   :  { %774 = vmatpush1.bf16.msra.mxu1 %v2026_v5  ;;  %v2133_v5 = vld [vmem:[#allocation5 + $0xd4] ss:$8 sps:$4 sm:$0xff]  }
  0x71   :  { %775 = vmatprep.subr.bf16.mxu1 %v2031_v7  ;;  %1282 = vmatpush1.bf16.msra.mxu0 %v2119_v36  ;;  %v2091_v7 = vld [vmem:[#allocation3 + $0x2ec] ss:$16 sps:$4 sm:$0xff]  }
  0x72   :  { %1283 = vmatprep.subr.bf16.mxu0 %v2124_v38 }
  0x74   :  { %776 = vmatpush1.bf16.msra.mxu1 %v2029_v9  ;;  %v2134_v9 = vld [vmem:[#allocation5 + $0xe0] ss:$8 sps:$4 sm:$0xff]  }
  0x75   :  { %777 = vmatprep.subr.bf16.mxu1 %v2034_v11  ;;  %1284 = vmatpush1.bf16.msra.mxu0 %v2122_v41  ;;  %v2139_v11 = vld [vmem:[#allocation5 + $0xf4] ss:$8 sps:$4 sm:$0xff]  }
  0x76   :  { %1285 = vmatprep.subr.bf16.mxu0 %v2127_v43 }
  0x78   :  { %778 = vmatpush1.bf16.msra.mxu1 %v2032_v13  ;;  %v2142_v13 = vld [vmem:[#allocation5 + $0x104] ss:$8 sps:$4 sm:$0xff]  }
  0x79   :  { %779 = vmatprep.subr.bf16.mxu1 %v2037_v15  ;;  %1286 = vmatpush1.bf16.msra.mxu0 %v2125_v45  ;;  %v2189_v15 = vld [vmem:[%s2528_s5] sm:$0xff]  }
  0x7a   :  { %1287 = vmatprep.subr.bf16.mxu0 %v2130_v47 }
  0x7c   :  { %780 = vmatpush1.bf16.msra.mxu1 %v2035_v17 }
  0x7d   :  { %781 = vmatprep.subr.bf16.mxu1 %v2040_v18  ;;  %1288 = vmatpush1.bf16.msra.mxu0 %v2128_v49 }
  0x7e   :  { %1289 = vmatprep.subr.bf16.mxu0 %v2133_v5  ;;  %v2161_v5 = vld [vmem:[#allocation5 + $0x170] ss:$8 sps:$4 sm:$0xff]  }
  0x80   :  { %782 = vmatpush1.bf16.msra.mxu1 %v2038_v21 }
  0x81   :  { %783 = vmatprep.subr.bf16.mxu1 %v2043_v23  ;;  %v2193_v23 = vld [vmem:[%s2528_s5 + $0x10] sm:$0xff]  }
  0x84   :  { %784 = vmatpush1.bf16.msra.mxu1 %v2041_v25  ;;  %v2394_v25 = vshrl.u32 %v183_v22, 7 }
  0x85   :  { %785 = vmatprep.subr.bf16.mxu1 %v2046_v27  ;;  %v2196_v27 = vld [vmem:[%s2528_s5 + $0x60] sm:$0xff]  }
  0x86   :  { %v2403_v28 = vsub.s32 0, %v2394_v25  ;;  %v2411_v30 = vsub.s32 1, %v2394_v25 }
  0x88   :  { %786 = vmatpush1.bf16.msra.mxu1 %v2044_v29  ;;  %v2408_v29 = vld [vmem:[%s2525_s2] sm:$0xf] }
  0x89   :  { %787 = vmatprep.subr.bf16.mxu1 %v2049_v31  ;;  %v2197_v31 = vld [vmem:[%s2528_s5 + $0x20] sm:$0xff]   ;;  %v190_v34 = vrot.slane %v2408_v29, %v2411_v30 }
  0x8c   :  { %788 = vmatpush1.bf16.msra.mxu1 %v2047_v33  ;;  %v186_v33 = vrot.slane %v2408_v29, %v2403_v28 }
  0x8d   :  { %789 = vmatprep.subr.bf16.mxu1 %v2052_v35 }
  0x90   :  { %790 = vmatpush1.bf16.msra.mxu1 %v2050_v37 }
  0x91   :  { %791 = vmatprep.subr.bf16.mxu1 %v2055_v39 }
  0x94   :  { %792 = vmatpush1.bf16.msra.mxu1 %v2053_v42 }
  0x95   :  { %793 = vmatprep.subr.bf16.mxu1 %v2058_v44 }
  0x98   :  { %794 = vmatpush1.bf16.msra.mxu1 %v2056_v46 }
  0x99   :  { %795 = vmatprep.subr.bf16.mxu1 %v2061_v48 }
  0x9c   :  { %796 = vmatpush1.bf16.msra.mxu1 %v2059_v50 }
  0x9d   :  { %797 = vmatprep.subr.bf16.mxu1 %v2064_v52 }
  0xa0   :  { %798 = vmatpush1.bf16.msra.mxu1 %v2062_v53 }
  0xa1   :  { %799 = vmatprep.subr.bf16.mxu1 %v2067_v54 }
  0xa4   :  { %800 = vmatpush1.bf16.msra.mxu1 %v2065_v55  ;;  %v2140_v55 = vld [vmem:[#allocation5 + $0x100] ss:$8 sps:$4 sm:$0xff]  }
  0xa5   :  { %812 = vmatprep.subr.bf16.mxu1 %v2070_v56  ;;  %v2145_v56 = vld [vmem:[#allocation5 + $0x114] ss:$8 sps:$4 sm:$0xff]  }
  0xa7   :  { %802 = vmatmul.mubr.bf16.vlgmr.msra.gmra.mrb[4].mxu1 %v2356_v40  ;;  %v2083_v40 = vld [vmem:[#allocation3 + $0x2a8] ss:$16 sps:$4 sm:$0xff]  }
  0xa8   :  { %813 = vmatpush1.bf16.msra.mxu1 %v2068_v57  ;;  %844 = vmatprep.mubr.bf16.mxu1 %v2258_v0  ;;  %v2131_v0 = vld [vmem:[#allocation5 + $0xd0] ss:$8 sps:$4 sm:$0xff]  }
  0xa9   :  { %814 = vmatprep.subr.bf16.mxu1 %v2073_v58  ;;  %1290 = vmatpush1.bf16.msra.mxu0 %v2131_v0  ;;  %v2143_v57 = vld [vmem:[#allocation5 + $0x110] ss:$8 sps:$4 sm:$0xff]   ;;  %v2148_v58 = vld [vmem:[#allocation5 + $0x124] ss:$8 sps:$4 sm:$0xff]  }
  0xaa   :  { %1291 = vmatprep.subr.bf16.mxu0 %v2136_v8  ;;  %v2166_v0 = vld [vmem:[#allocation5 + $0x184] ss:$8 sps:$4 sm:$0xff]   ;;  %v2167_v8 = vld [vmem:[#allocation5 + $0x190] ss:$8 sps:$4 sm:$0xff]  }
  0xac   :  { %815 = vmatpush1.bf16.msra.mxu1 %v2071_v59  ;;  %v2146_v59 = vld [vmem:[#allocation5 + $0x120] ss:$8 sps:$4 sm:$0xff]  }
  0xad   :  { %816 = vmatprep.subr.bf16.mxu1 %v2076_v60  ;;  %1292 = vmatpush1.bf16.msra.mxu0 %v2134_v9  ;;  %v2151_v60 = vld [vmem:[#allocation5 + $0x134] ss:$8 sps:$4 sm:$0xff]   ;;  %v2172_v9 = vld [vmem:[#allocation5 + $0x1a4] ss:$8 sps:$4 sm:$0xff]  }
  0xae   :  { %1293 = vmatprep.subr.bf16.mxu0 %v2139_v11  ;;  %v2175_v11 = vld [vmem:[#allocation5 + $0x1b4] ss:$8 sps:$4 sm:$0xff]  }
  0xb0   :  { %817 = vmatpush1.bf16.msra.mxu1 %v2074_v61  ;;  %v2149_v61 = vld [vmem:[#allocation5 + $0x130] ss:$8 sps:$4 sm:$0xff]  }
  0xb1   :  { %818 = vmatprep.subr.bf16.mxu1 %v2079_v62  ;;  %1294 = vmatpush1.bf16.msra.mxu0 %v2137_v12  ;;  %v2154_v62 = vld [vmem:[#allocation5 + $0x144] ss:$8 sps:$4 sm:$0xff]   ;;  %v2173_v12 = vld [vmem:[#allocation5 + $0x1b0] ss:$8 sps:$4 sm:$0xff]  }
  0xb2   :  { %1306 = vmatprep.subr.bf16.mxu0 %v2142_v13  ;;  %v2178_v13 = vld [vmem:[#allocation5 + $0x1c4] ss:$8 sps:$4 sm:$0xff]  }
  0xb4   :  { %819 = vmatpush1.bf16.msra.mxu1 %v2077_v63  ;;  %v2152_v63 = vld [vmem:[#allocation5 + $0x140] ss:$8 sps:$4 sm:$0xff]  }
  0xb5   :  { %820 = vmatprep.subr.bf16.mxu1 %v2082_v1  ;;  %v2157_v1 = vld [vmem:[#allocation5 + $0x154] ss:$8 sps:$4 sm:$0xff]  }
  0xb8   :  { %821 = vmatpush1.bf16.msra.mxu1 %v2080_v2  ;;  %v2155_v2 = vld [vmem:[#allocation5 + $0x150] ss:$8 sps:$4 sm:$0xff]  }
  0xb9   :  { %822 = vmatprep.subr.bf16.mxu1 %v2085_v3  ;;  %v2160_v3 = vld [vmem:[#allocation5 + $0x164] ss:$8 sps:$4 sm:$0xff]  }
  0xbc   :  { %823 = vmatpush1.bf16.msra.mxu1 %v2083_v40  ;;  %v2158_v40 = vld [vmem:[#allocation5 + $0x160] ss:$8 sps:$4 sm:$0xff]  }
  0xbd   :  { %824 = vmatprep.subr.bf16.mxu1 %v2088_v4  ;;  %v2163_v4 = vld [vmem:[#allocation5 + $0x174] ss:$8 sps:$4 sm:$0xff]  }
  0xc0   :  { %825 = vmatpush1.bf16.msra.mxu1 %v2086_v6  ;;  %v2164_v6 = vld [vmem:[#allocation5 + $0x180] ss:$8 sps:$4 sm:$0xff]  }
  0xc1   :  { %826 = vmatprep.subr.bf16.mxu1 %v2091_v7  ;;  %v2169_v7 = vld [vmem:[#allocation5 + $0x194] ss:$8 sps:$4 sm:$0xff]  }
  0xc4   :  { %827 = vmatpush1.bf16.msra.mxu1 %v2089_v10  ;;  %v2170_v10 = vld [vmem:[#allocation5 + $0x1a0] ss:$8 sps:$4 sm:$0xff]  }
  0xc5   :  { %1895 = vmatprep.subr.bf16.mxu1 %v2188_v14  ;;  %v2176_v14 = vld [vmem:[#allocation5 + $0x1c0] ss:$8 sps:$4 sm:$0xff]  }
  0xc7   :  { %845 = vmatmul.mubr.bf16.vlgmr.msra.gmra.mrb[4].mxu1 %v2365_v51  ;;  %v2191_v51 = vld [vmem:[%s2528_s5 + $0x8] sm:$0xff]  }
  0xc8   :  { %1896 = vmatpush3.bf16.msra.mxu1 %v2189_v15  ;;  %v2181_v15 = vld [vmem:[#allocation5 + $0x1d4] ss:$8 sps:$4 sm:$0xff]  }
  0xc9   :  { %1897 = vmatprep.subr.bf16.mxu1 %v2190_v16  ;;  %v2179_v16 = vld [vmem:[#allocation5 + $0x1d0] ss:$8 sps:$4 sm:$0xff]  }
  0xcc   :  { %1898 = vmatpush3.bf16.msra.mxu1 %v2191_v51  ;;  %v2187_v51 = vld [vmem:[#allocation5 + $0x1f4] ss:$8 sps:$4 sm:$0xff]  }
  0xcd   :  { %1899 = vmatprep.subr.bf16.mxu1 %v2192_v20  ;;  %v193_v20 = vsub.s32 2, %v2394_v25 }
  0xd0   :  { %1900 = vmatpush3.bf16.msra.mxu1 %v2193_v23  ;;  %v194_v23 = vrot.slane %v2408_v29, %v193_v20 }
  0xd1   :  { %1901 = vmatprep.subr.bf16.mxu1 %v2194_v24 }
  0xd4   :  { %1902 = vmatpush3.bf16.msra.mxu1 %v2195_v26 }
  0xd5   :  { %1903 = vmatprep.subr.bf16.mxu1 %v2196_v27 }
  0xd8   :  { %1904 = vmatpush3.bf16.msra.mxu1 %v2197_v31 }
  0xd9   :  { %1905 = vmatprep.subr.bf16.mxu1 %v2198_v32 }
 0x11f   :  { %v760_v17 = vpop.f32.mrb[0].mxu0 }
 0x120   :  { %v762_v18 = vpop.f32.mrb[1].mxu0 }
 0x121   :  { %v764_v19 = vpop.f32.mrb[2].mxu0 }
 0x122   :  { %v766_v21 = vpop.f32.mrb[3].mxu0 }
 0x13a   :  { %v717_v35 = vpop.f32.mrb[0].mxu1 }
 0x13b   :  { %v718_v36 = vadd.f32 %v717_v35, %v186_v33  ;;  %v719_v37 = vpop.f32.mrb[1].mxu1 }
 0x13c   :  { %v720_v38 = vadd.f32 %v719_v37, %v190_v34  ;;  %v721_v39 = vpop.f32.mrb[2].mxu1 }
 0x13d   :  { %v722_v41 = vadd.f32 %v721_v39, %v186_v33  ;;  %v761_v42 = vadd.f32 %v760_v17, %v718_v36  ;;  %v723_v43 = vpop.f32.mrb[3].mxu1  ;;  %v2184_v17 = vld [vmem:[#allocation5 + $0x1e4] ss:$8 sps:$4 sm:$0xff]  }
 0x13e   :  { %v724_v44 = vadd.f32 %v723_v43, %v190_v34  ;;  %v763_v45 = vadd.f32 %v762_v18, %v720_v38  ;;  %v2182_v18 = vld [vmem:[#allocation5 + $0x1e0] ss:$8 sps:$4 sm:$0xff]  }
 0x13f   :  { %v855_v46 = vmax.f32 %v761_v42, 0.0  ;;  %v765_v47 = vadd.f32 %v764_v19, %v722_v41  ;;  %v2185_v19 = vld [vmem:[#allocation5 + $0x1f0] ss:$8 sps:$4 sm:$0xff]  }
 0x140   :  { %v767_v48 = vadd.f32 %v766_v21, %v724_v44  ;;  %v856_v50 = vmax.f32 %v763_v45, 0.0  ;;  %v197_v21 = vsub.s32 3, %v2394_v25  ;;  %v2200_v44 = vld [vmem:[%s2528_s5 + $0x70] sm:$0xff]  }
 0x141   :  { %v859_v49 = vmax.f32 %v765_v47, 0.0  ;;  %v2201_v45 = vld [vmem:[%s2528_s5 + $0x30] sm:$0xff]   ;;  %v2203_v47 = vld [vmem:[%s2528_s5 + $0x38] sm:$0xff]  }
 0x142   :  { %v860_v52 = vmax.f32 %v767_v48, 0.0  ;;  %v198_v24 = vrot.slane %v2408_v29, %v197_v21  ;;  %v2199_v29 = vld [vmem:[%s2528_s5 + $0x28] sm:$0xff]   ;;  %v931_v48 = vld [vmem:[%s2527_s4] sm:$0x3] }
 0x143   :  { %v863_v53 = vpack.c.bf16 %v859_v49, %v855_v46  ;;  %1906 = vmatpush3.bf16.msra.mxu1 %v2199_v29  ;;  %v2202_v46 = vld [vmem:[%s2528_s5 + $0x78] sm:$0xff]   ;;  %v936_v49 = vrot.slane %v931_v48, %v2403_v28 }
 0x144   :  { %v864_v54 = vpack.c.bf16 %v860_v52, %v856_v50  ;;  %1907 = vmatprep.subr.bf16.mxu1 %v2200_v44  ;;  %v940_v50 = vrot.slane %v931_v48, %v2411_v30 }
 0x146   :  { %1295 = vmatprep.mubr.bf16.mxu0 %v864_v54 }
 0x147   :  { %1296 = vmatmul.mubr.bf16.vlgmr.msra.gmra.mrb[4].mxu0 %v863_v53  ;;  %1908 = vmatpush3.bf16.msra.mxu1 %v2201_v45  ;;  %v1644_v45 = vsub.s32 7, %v2394_v25 }
 0x148   :  { %1307 = vmatpush1.bf16.msra.mxu0 %v2140_v55  ;;  %1909 = vmatprep.subr.bf16.mxu1 %v2202_v46 }
 0x149   :  { %1308 = vmatprep.subr.bf16.mxu0 %v2145_v56 }
 0x14b   :  { %1910 = vmatpush3.bf16.msra.mxu1 %v2203_v47 }
 0x14c   :  { %1309 = vmatpush1.bf16.msra.mxu0 %v2143_v57 }
 0x14d   :  { %1310 = vmatprep.subr.bf16.mxu0 %v2148_v58 }
 0x150   :  { %1311 = vmatpush1.bf16.msra.mxu0 %v2146_v59 }
 0x151   :  { %1312 = vmatprep.subr.bf16.mxu0 %v2151_v60 }
 0x154   :  { %1313 = vmatpush1.bf16.msra.mxu0 %v2149_v61 }
 0x155   :  { %1314 = vmatprep.subr.bf16.mxu0 %v2154_v62 }
 0x158   :  { %1315 = vmatpush1.bf16.msra.mxu0 %v2152_v63 }
 0x159   :  { %1316 = vmatprep.subr.bf16.mxu0 %v2157_v1 }
 0x15c   :  { %1317 = vmatpush1.bf16.msra.mxu0 %v2155_v2 }
 0x15d   :  { %1318 = vmatprep.subr.bf16.mxu0 %v2160_v3 }
 0x160   :  { %1319 = vmatpush1.bf16.msra.mxu0 %v2158_v40  ;;  %v1876_v40 = vld [vmem:[%s2529_s6] ss:$0 sm:$0xff] }
 0x161   :  { %1320 = vmatprep.subr.bf16.mxu0 %v2163_v4 }
 0x164   :  { %1321 = vmatpush1.bf16.msra.mxu0 %v2161_v5  ;;  %v1533_v5 = vld [vmem:[%s2530_s7] sm:$0xff] }
 0x165   :  { %1322 = vmatprep.subr.bf16.mxu0 %v2166_v0 }
 0x168   :  { %1323 = vmatpush1.bf16.msra.mxu0 %v2164_v6 }
 0x169   :  { %1324 = vmatprep.subr.bf16.mxu0 %v2169_v7 }
 0x16c   :  { %1325 = vmatpush1.bf16.msra.mxu0 %v2167_v8 }
 0x16d   :  { %1326 = vmatprep.subr.bf16.mxu0 %v2172_v9 }
 0x170   :  { %1327 = vmatpush1.bf16.msra.mxu0 %v2170_v10  ;;  %v1555_v10 = vrot.slane %v1533_v5, %v2411_v30 }
 0x171   :  { %1328 = vmatprep.subr.bf16.mxu0 %v2175_v11  ;;  %v1539_v11 = vrot.slane %v1533_v5, %v2403_v28 }
 0x174   :  { %1329 = vmatpush1.bf16.msra.mxu0 %v2173_v12 }
 0x175   :  { %1330 = vmatprep.subr.bf16.mxu0 %v2178_v13 }
 0x178   :  { %1331 = vmatpush1.bf16.msra.mxu0 %v2176_v14  ;;  %v1570_v14 = vrot.slane %v1533_v5, %v193_v20  ;;  %v1614_v20 = vsub.s32 5, %v2394_v25 }
 0x179   :  { %1332 = vmatprep.subr.bf16.mxu0 %v2181_v15 }
 0x17c   :  { %1333 = vmatpush1.bf16.msra.mxu0 %v2179_v16 }
 0x17d   :  { %1334 = vmatprep.subr.bf16.mxu0 %v2184_v17 }
 0x180   :  { %1335 = vmatpush1.bf16.msra.mxu0 %v2182_v18  ;;  %v1585_v18 = vrot.slane %v1533_v5, %v197_v21  ;;  %v1615_v21 = vrot.slane %v1533_v5, %v1614_v20 }
 0x181   :  { %1336 = vmatprep.subr.bf16.mxu0 %v2187_v51  ;;  %v1599_v51 = vsub.s32 4, %v2394_v25 }
 0x184   :  { %1337 = vmatpush1.bf16.msra.mxu0 %v2185_v19 }
 0x19a   :  { %v846_v26 = vpop.f32.mrb[4].mxu1 }
 0x19b   :  { %v1925_v27 = vadd.f32 %v846_v26, %v194_v23  ;;  %v848_v31 = vpop.f32.mrb[5].mxu1 }
 0x19c   :  { %v1926_v32 = vadd.f32 %v848_v31, %v198_v24  ;;  %v850_v33 = vpop.f32.mrb[6].mxu1 }
 0x19d   :  { %v1927_v34 = vadd.f32 %v850_v33, %v194_v23  ;;  %v852_v35 = vpop.f32.mrb[7].mxu1  ;;  %v857_v37 = vmax.f32 %v1925_v27, 0.0  ;;  %v1600_v27 = vrot.slane %v1533_v5, %v1599_v51 }
 0x19e   :  { %v1928_v36 = vadd.f32 %v852_v35, %v198_v24  ;;  %v858_v39 = vmax.f32 %v1926_v32, 0.0 }
 0x19f   :  { %v861_v38 = vmax.f32 %v1927_v34, 0.0 }
 0x1a0   :  { %v862_v41 = vmax.f32 %v1928_v36, 0.0 }
 0x1a1   :  { %v865_v42 = vpack.c.bf16 %v861_v38, %v857_v37 }
 0x1a2   :  { %v866_v43 = vpack.c.bf16 %v862_v41, %v858_v39  ;;  %v1629_v39 = vsub.s32 6, %v2394_v25 }
 0x1a4   :  { %1338 = vmatprep.mubr.bf16.mxu0 %v866_v43  ;;  %v1630_v44 = vrot.slane %v1533_v5, %v1629_v39 }
 0x1a5   :  { %1339 = vmatmul.mubr.bf16.vlgmr.msra.gmra.mrb[4].mxu0 %v865_v42 }
 0x278   :  { %v1340_v52 = vpop.f32.mrb[4].mxu0 }
 0x279   :  { %v1929_v53 = vadd.f32 %v1340_v52, %v936_v49  ;;  %v1342_v54 = vpop.f32.mrb[5].mxu0 }
 0x27a   :  { %v1930_v55 = vadd.f32 %v1342_v54, %v940_v50  ;;  %v1344_v56 = vpop.f32.mrb[6].mxu0 }
 0x27b   :  { %v1931_v57 = vadd.f32 %v1344_v56, %v936_v49  ;;  %v1346_v58 = vpop.f32.mrb[7].mxu0  ;;  %v1349_v60 = vmax.f32 %v1929_v53, 0.0 }
 0x27c   :  { %v1932_v59 = vadd.f32 %v1346_v58, %v940_v50  ;;  %v1350_v62 = vmax.f32 %v1930_v55, 0.0  ;;  %v1645_v50 = vrot.slane %v1533_v5, %v1644_v45  ;;  %v2480_v5 = vand.u32 127, %v183_v22 }
 0x27d   :  { %v1351_v61 = vmax.f32 %v1931_v57, 0.0 }
 0x27e   :  { %v1352_v63 = vmax.f32 %v1932_v59, 0.0  ;;  %vm1549_vm3 = vcmp.eq.s32.totalorder %v2480_v5, 0  ;;  %vm1564_vm4 = vcmp.eq.s32.totalorder %v2480_v5, 1  ;;  %vm1579_vm5 = vcmp.eq.s32.totalorder %v2480_v5, 2 }
 0x27f   :  { %v1353_v1 = vpack.c.bf16 %v1351_v61, %v1349_v60  ;;  %vm1594_vm6 = vcmp.eq.s32.totalorder %v2480_v5, 3  ;;  %vm1609_vm7 = vcmp.eq.s32.totalorder %v2480_v5, 4  ;;  %vm1624_vm8 = vcmp.eq.s32.totalorder %v2480_v5, 5 }
 0x280   :  { %v1354_v2 = vpack.c.bf16 %v1352_v63, %v1350_v62  ;;  %vm1639_vm9 = vcmp.eq.s32.totalorder %v2480_v5, 6  ;;  %vm1654_vm10 = vcmp.eq.s32.totalorder %v2480_v5, 7 }
 0x282   :  { %1522 = vmatprep.mubr.bf16.mxu1 %v1354_v2 }
 0x283   :  { %1523 = vmatmul.mubr.bf16.vlgmr.msra.gmra.mrb[8].mxu1 %v1353_v1 }
 0x356   :  { %v1911_v3 = vpop.f32.mrb[8].mxu1 }
 0x357   :  { %v1912_v4 = vpop.f32.mrb[9].mxu1 }
 0x358   :  { %v1913_v0 = vadd.f32 %v1912_v4, %v1911_v3  ;;  %v1914_v6 = vpop.f32.mrb[10].mxu1 }
 0x359   :  { %v1915_v7 = vpop.f32.mrb[11].mxu1 }
 0x35a   :  { %v1525_v8 = vadd.f32 %v1913_v0, %v1876_v40  ;;  %v1916_v9 = vadd.f32 %v1915_v7, %v1914_v6 }
 0x35c   :  { %v1531_v12 = vmax.f32 %v1525_v8, 0.0  ;;  %v1528_v13 = vadd.f32 %v1916_v9, %v1876_v40 }
 0x35e   :  { %v1532_v15 = vmax.f32 %v1528_v13, 0.0  ;;  %v1556_v16 = vmul.f32 %v1555_v10, %v1531_v12  ;;  %v1540_v17 = vmul.f32 %v1539_v11, %v1531_v12  ;;  %v1571_v26 = vmul.f32 %v1570_v14, %v1531_v12 }
 0x35f   :  { %v1586_v34 = vmul.f32 %v1585_v18, %v1531_v12  ;;  %v1601_v38 = vmul.f32 %v1600_v27, %v1531_v12  ;;  %v1616_v29 = vmul.f32 %v1615_v21, %v1531_v12  ;;  %v1631_v55 = vmul.f32 %v1630_v44, %v1531_v12 }
 0x360   :  { %v1558_v19 = vsel %vm1542_vm2, %v1556_v16, 0.0  ;;  %v1543_v23 = vsel %vm1542_vm2, %v1540_v17, 0.0  ;;  %v1557_v24 = vmul.f32 %v1555_v10, %v1532_v15  ;;  %v1573_v32 = vsel %vm1542_vm2, %v1571_v26, 0.0  ;;  %v1893_v26 = vld [vmem:[%s2531_s8] ss:$0 sm:$0xff] }
 0x361   :  { %1559 = vadd.xlane.f32.xlu1 %v1558_v19  ;;  %1544 = vadd.xlane.f32.xlu0 %v1543_v23  ;;  %v1572_v33 = vmul.f32 %v1570_v14, %v1532_v15  ;;  %v1588_v36 = vsel %vm1542_vm2, %v1586_v34, 0.0  ;;  %v1587_v37 = vmul.f32 %v1585_v18, %v1532_v15  ;;  %v1603_v42 = vsel %vm1542_vm2, %v1601_v38, 0.0 }
 0x362   :  { %v1561_v31 = vsel %vm1542_vm2, %v1557_v24, 0.0  ;;  %v1602_v43 = vmul.f32 %v1600_v27, %v1532_v15  ;;  %v1618_v47 = vsel %vm1542_vm2, %v1616_v29, 0.0  ;;  %v1617_v48 = vmul.f32 %v1615_v21, %v1532_v15  ;;  %v1668_v27 = vld [vmem:[%s2532_s9] sm:$0x3] }
 0x363   :  { %v1576_v35 = vsel %vm1542_vm2, %v1572_v33, 0.0  ;;  %v1591_v41 = vsel %vm1542_vm2, %v1587_v37, 0.0  ;;  %v1541_v49 = vmul.f32 %v1539_v11, %v1532_v15  ;;  %v1632_v54 = vmul.f32 %v1630_v44, %v1532_v15 }
 0x364   :  { %v1606_v46 = vsel %vm1542_vm2, %v1602_v43, 0.0  ;;  %v1621_v52 = vsel %vm1542_vm2, %v1617_v48, 0.0  ;;  %v1633_v25 = vsel %vm1542_vm2, %v1631_v55, 0.0  ;;  %v1647_v57 = vmul.f32 %v1645_v50, %v1532_v15 }
 0x365   :  { %1562 = vadd.xlane.f32.xlu1 %v1561_v31  ;;  %1574 = vadd.xlane.f32.xlu0 %v1573_v32  ;;  %v1546_v53 = vsel %vm1542_vm2, %v1541_v49, 0.0  ;;  %v1636_v56 = vsel %vm1542_vm2, %v1632_v54, 0.0  ;;  %v1646_v58 = vmul.f32 %v1645_v50, %v1531_v12  ;;  %v1687_v39 = vrot.slane %v1668_v27, %v2411_v30 }
 0x366   :  { %v1651_v59 = vsel %vm1542_vm2, %v1647_v57, 0.0 }
 0x367   :  { %v1648_v60 = vsel %vm1542_vm2, %v1646_v58, 0.0 }
 0x369   :  { %1577 = vadd.xlane.f32.xlu1 %v1576_v35  ;;  %1589 = vadd.xlane.f32.xlu0 %v1588_v36  ;;  %v1672_v36 = vrot.slane %v1668_v27, %v2403_v28  ;;  %v1894_v28 = vld [vmem:[%s2533_s10] ss:$0 sm:$0xff] }
 0x36d   :  { %1592 = vadd.xlane.f32.xlu1 %v1591_v41  ;;  %1604 = vadd.xlane.f32.xlu0 %v1603_v42 }
 0x371   :  { %1607 = vadd.xlane.f32.xlu1 %v1606_v46  ;;  %1619 = vadd.xlane.f32.xlu0 %v1618_v47 }
 0x375   :  { %1622 = vadd.xlane.f32.xlu1 %v1621_v52  ;;  %1547 = vadd.xlane.f32.xlu0 %v1546_v53 }
 0x379   :  { %1637 = vadd.xlane.f32.xlu1 %v1636_v56  ;;  %1634 = vadd.xlane.f32.xlu0 %v1633_v25 }
 0x37d   :  { %1652 = vadd.xlane.f32.xlu1 %v1651_v59  ;;  %1649 = vadd.xlane.f32.xlu0 %v1648_v60 }
 0x3ee   :  { %v1560_v61 = vpop.xlane.xlu1 %1559  ;;  %v1545_v62 = vpop.xlane.xlu0 %1544 }
 0x3ef   :  { %v1550_v7 = vsel %vm1549_vm3, %v1545_v62, 0.0 }
 0x3f0   :  { %v1565_v11 = vsel %vm1564_vm4, %v1560_v61, %v1550_v7 }
 0x3f2   :  { %v1563_v63 = vpop.xlane.xlu1 %1562  ;;  %v1575_v1 = vpop.xlane.xlu0 %1574 }
 0x3f3   :  { %v1580_v13 = vsel %vm1579_vm5, %v1575_v1, %v1565_v11 }
 0x3f6   :  { %v1578_v2 = vpop.xlane.xlu1 %1577  ;;  %v1590_v3 = vpop.xlane.xlu0 %1589 }
 0x3f7   :  { %v1595_v17 = vsel %vm1594_vm6, %v1590_v3, %v1580_v13 }
 0x3fa   :  { %v1593_v40 = vpop.xlane.xlu1 %1592  ;;  %v1605_v4 = vpop.xlane.xlu0 %1604 }
 0x3fb   :  { %v1610_v51 = vsel %vm1609_vm7, %v1605_v4, %v1595_v17 }
 0x3fe   :  { %v1608_v0 = vpop.xlane.xlu1 %1607  ;;  %v1620_v6 = vpop.xlane.xlu0 %1619 }
 0x3ff   :  { %v1625_v23 = vsel %vm1624_vm8, %v1620_v6, %v1610_v51 }
 0x402   :  { %v1623_v8 = vpop.xlane.xlu1 %1622  ;;  %v1548_v9 = vpop.xlane.xlu0 %1547 }
 0x403   :  { %v1551_v10 = vsel %vm1549_vm3, %v1548_v9, 0.0 }
 0x404   :  { %v1566_v22 = vsel %vm1564_vm4, %v1563_v63, %v1551_v10 }
 0x405   :  { %v1581_v12 = vsel %vm1579_vm5, %v1578_v2, %v1566_v22 }
 0x406   :  { %v1596_v14 = vsel %vm1594_vm6, %v1593_v40, %v1581_v12  ;;  %v1638_v15 = vpop.xlane.xlu1 %1637  ;;  %v1635_v16 = vpop.xlane.xlu0 %1634 }
 0x407   :  { %v1611_v18 = vsel %vm1609_vm7, %v1608_v0, %v1596_v14  ;;  %v1640_v20 = vsel %vm1639_vm9, %v1635_v16, %v1625_v23 }
 0x408   :  { %v1626_v19 = vsel %vm1624_vm8, %v1623_v8, %v1611_v18 }
 0x409   :  { %v1641_v24 = vsel %vm1639_vm9, %v1638_v15, %v1626_v19 }
 0x40a   :  { %v1653_v31 = vpop.xlane.xlu1 %1652  ;;  %v1650_v32 = vpop.xlane.xlu0 %1649 }
 0x40b   :  { %v1656_v33 = vsel %vm1654_vm10, %v1653_v31, %v1641_v24  ;;  %v1655_v34 = vsel %vm1654_vm10, %v1650_v32, %v1640_v20 }
 0x40c   :  { %v1665_v21 = vadd.f32 %v1893_v26, %v1656_v33  ;;  %v1664_v35 = vadd.f32 %v1893_v26, %v1655_v34 }
 0x40e   :  { %v1667_v37 = vmax.f32 %v1665_v21, 0.0  ;;  %v1666_v38 = vmax.f32 %v1664_v35, 0.0 }
 0x410   :  { %v1674_v41 = vmul.f32 %v1672_v36, %v1667_v37  ;;  %v1673_v42 = vmul.f32 %v1672_v36, %v1666_v38  ;;  %v1689_v44 = vmul.f32 %v1687_v39, %v1667_v37  ;;  %v1688_v45 = vmul.f32 %v1687_v39, %v1666_v38 }
 0x412   :  { %v1679_v43 = vsel %vm1675_vm11, %v1674_v41, 0.0  ;;  %v1676_v29 = vsel %vm1675_vm11, %v1673_v42, 0.0  ;;  %v1693_v46 = vsel %vm1675_vm11, %v1689_v44, 0.0  ;;  %v1690_v47 = vsel %vm1675_vm11, %v1688_v45, 0.0 }
 0x413   :  { %1680 = vadd.xlane.f32.xlu1 %v1679_v43  ;;  %1677 = vadd.xlane.f32.xlu0 %v1676_v29 }
 0x417   :  { %1694 = vadd.xlane.f32.xlu1 %v1693_v46  ;;  %1691 = vadd.xlane.f32.xlu0 %v1690_v47 }
 0x4a0   :  { %v1681_v48 = vpop.xlane.xlu1 %1680  ;;  %v1678_v49 = vpop.xlane.xlu0 %1677 }
 0x4a1   :  { %v1683_v30 = vsel %vm1549_vm3, %v1681_v48, 0.0  ;;  %v1682_v50 = vsel %vm1549_vm3, %v1678_v49, 0.0 }
 0x4a4   :  { %v1695_v52 = vpop.xlane.xlu1 %1694  ;;  %v1692_v53 = vpop.xlane.xlu0 %1691 }
 0x4a5   :  { %v1697_v54 = vsel %vm1564_vm4, %v1695_v52, %v1683_v30  ;;  %v1696_v55 = vsel %vm1564_vm4, %v1692_v53, %v1682_v50 }
 0x4a6   :  { %v1706_v56 = vadd.f32 %v1894_v28, %v1697_v54  ;;  %v1705_v25 = vadd.f32 %v1894_v28, %v1696_v55 }
 0x4a8   :  { %1709 = vst.msk [vmem:[%s2534_s11 + $0x8] sm:$0xff] %vm1707_vm12, %v1706_v56  ;;  %1708 = vst.msk [vmem:[%s2534_s11] sm:$0xff] %vm1707_vm12, %v1705_v25 }
 0x4a9   :  { %1714 = vsyncpa [#allocation4], 1 }
 0x4aa   :  { %1715 = vsyncpa [#allocation6], 1 }

</bundles_post_ra>
